<compile_context>
chip_gen: v5e
topology: v5e:2x2
jax: 0.10.0
libtpu: 0.0.40
codegen_flags: <defaults>
</compile_context>

<pallas_src>
import functools
import math

import jax
import jax.numpy as jnp
from jax.experimental import pallas as pl
from jax.experimental.pallas import tpu as pltpu


# ---------------------------------------------------------------------------
# Kernel 1: single-step GRU cell + (D^{-1/2} X) @ W   (grid-less, one launch)
# ---------------------------------------------------------------------------
def _gru_xw_kernel(x_tilde_ref, h_ref, wiT_ref, whT_ref, bi_ref, bh_ref,
                   x_ref, dis_ref, w_out_ref, xw_out_ref):
    cp = h_ref.shape[1]                                       # padded channels
    xt = x_tilde_ref[...]                                     # [Cp, Cp] f32
    h = h_ref[...]                                            # [Cp, Cp] f32

    # One fused matmul per input over all 3 gates (r, z, n), 128-aligned slices.
    gi = jnp.dot(xt, wiT_ref[...], preferred_element_type=jnp.float32) + bi_ref[...]
    gh = jnp.dot(h, whT_ref[...], preferred_element_type=jnp.float32) + bh_ref[...]

    r = jax.nn.sigmoid(gi[:, :cp] + gh[:, :cp])
    z = jax.nn.sigmoid(gi[:, cp:2 * cp] + gh[:, cp:2 * cp])
    n = jnp.tanh(gi[:, 2 * cp:] + r * gh[:, 2 * cp:])
    w_new = (1.0 - z) * n + z * h                             # evolved weight
    w_out_ref[...] = w_new

    # (D^{-1/2} X) @ W at bf16 MXU rate, f32 accumulate, stored bf16.
    xw = jnp.dot(x_ref[...], w_new.astype(jnp.bfloat16),
                 preferred_element_type=jnp.float32)
    xw_out_ref[...] = (dis_ref[...] * xw).astype(xw_out_ref.dtype)


# ---------------------------------------------------------------------------
# Kernel 2: streamed  out = D^{-1/2} * (A-hat @ XW_scaled)
#   grid = (row tiles, reduction tiles); accumulate directly into out_ref.
# ---------------------------------------------------------------------------
def _spmm_kernel(a_ref, xw_ref, dis_ref, out_ref, *, nk):
    # program_id only at top level (never inside pl.when bodies).
    k = pl.program_id(1)

    @pl.when(k == 0)
    def _init():
        out_ref[...] = jnp.zeros_like(out_ref)

    out_ref[...] += jnp.dot(a_ref[...], xw_ref[...],
                            preferred_element_type=jnp.float32)

    @pl.when(k == nk - 1)
    def _finalize():
        out_ref[...] = dis_ref[...] * out_ref[...]


# ---------------------------------------------------------------------------
# Helpers: padding / tile selection / VMEM budget
# ---------------------------------------------------------------------------
def _round_up(x, m):
    return ((x + m - 1) // m) * m


def _pick_tile(n, max_tile, align):
    """Largest aligned divisor of n that is <= max_tile, else the full extent."""
    t = min(max_tile, n)
    t -= t % align
    while t >= align:
        if n % t == 0:
            return t
        t -= align
    return n  # full extent is always a legal block size


def _vmem_budget_bytes():
    phys = 64 * 1024 * 1024        # conservative default (v7x physical VMEM)
    try:
        info = pltpu.get_tpu_info()
        phys = int(getattr(info, "vmem_capacity_bytes", phys)) or phys
    except Exception:
        pass
    return max(16 * 1024 * 1024, (phys * 3) // 4)   # ~25% headroom


def _choose_tiles(np_, cp, budget):
    """Largest (tm, tk) A-hat tiles that fit the per-generation VMEM budget."""
    def fits(tm, tk):
        a_buf = 2 * tm * tk * 2        # double-buffered bf16 A tiles
        xw_buf = 2 * tk * cp * 2       # double-buffered bf16 XW blocks
        out_buf = tm * cp * 4          # resident f32 output/accumulator block
        dis_buf = 2 * tm * 4
        return a_buf + xw_buf + out_buf + dis_buf <= budget

    tm_cap, tk_cap = 512, 4096
    tm = _pick_tile(np_, tm_cap, 16)   # 16-aligned: bf16 sublane packing
    tk = _pick_tile(np_, tk_cap, 128)
    while not fits(tm, tk) and tk_cap > 128:
        tk_cap //= 2
        tk = _pick_tile(np_, tk_cap, 128)
    while not fits(tm, tk) and tm_cap > 16:
        tm_cap //= 2
        tm = _pick_tile(np_, tm_cap, 16)
    return tm, tk


def _pad2d(x, rows, cols):
    return jnp.zeros((rows, cols), x.dtype).at[:x.shape[0], :x.shape[1]].set(x)


def _pad_gates_T(w, c, cp):
    """PyTorch GRU weight [3C, C] (gates r,z,n) -> padded transposed [Cp, 3Cp]."""
    w3 = w.reshape(3, c, c)                        # [gate, hidden, input]
    w3t = jnp.transpose(w3, (0, 2, 1))             # [gate, input, hidden]
    w3t_p = jnp.zeros((3, cp, cp), w.dtype).at[:, :c, :c].set(w3t)
    return jnp.concatenate([w3t_p[0], w3t_p[1], w3t_p[2]], axis=1)


def _pad_gate_bias(b, c, cp):
    b3 = b.reshape(3, c)
    b3p = jnp.zeros((3, cp), b.dtype).at[:, :c].set(b3)
    return b3p.reshape(1, 3 * cp)


# ---------------------------------------------------------------------------
# Fused pipeline: kernel 1 (GRU + XW) -> kernel 2 (tiled A-hat stream)
# ---------------------------------------------------------------------------
def _fused_evolvegcnh(x_tilde, h, wiT, whT, bi, bh, x, dis, a_bf16):
    np_, cp = x.shape
    budget = _vmem_budget_bytes()

    w_new, xw = pl.pallas_call(
        _gru_xw_kernel,
        out_shape=(jax.ShapeDtypeStruct((cp, cp), jnp.float32),
                   jax.ShapeDtypeStruct((np_, cp), jnp.bfloat16)),
        compiler_params=pltpu.CompilerParams(vmem_limit_bytes=budget),
    )(x_tilde, h, wiT, whT, bi, bh, x, dis)

    tm, tk = _choose_tiles(np_, cp, budget)
    grid = (np_ // tm, np_ // tk)
    out = pl.pallas_call(
        functools.partial(_spmm_kernel, nk=grid[1]),
        out_shape=jax.ShapeDtypeStruct((np_, cp), jnp.float32),
        grid=grid,
        in_specs=[
            pl.BlockSpec((tm, tk), lambda i, k: (i, k)),   # A-hat tile (bf16)
            pl.BlockSpec((tk, cp), lambda i, k: (k, 0)),   # XW rows for this k
            pl.BlockSpec((tm, 1), lambda i, k: (i, 0)),    # D^{-1/2} rows
        ],
        out_specs=pl.BlockSpec((tm, cp), lambda i, k: (i, 0)),
        compiler_params=pltpu.CompilerParams(
            dimension_semantics=("parallel", "arbitrary"),
            vmem_limit_bytes=budget),
    )(a_bf16, xw, dis)
    return out, w_new


# ---------------------------------------------------------------------------
# Forward pass (glue: pooling score / top-k / gather, dense A-hat, D^{-1/2})
# ---------------------------------------------------------------------------
def evolve_gcn_h_forward(params, X, edge_index, edge_weight=None,
                         improved=False, add_self_loops=True):
    N, C = X.shape
    if N < C:
        raise ValueError("EvolveGCNH requires num_of_nodes >= in_channels "
                         "(top-k pooling must keep exactly in_channels nodes).")

    # --- TopKPooling score + selection (O(N*C) / O(N log N) XLA glue) ---
    p = params["pool_p"]                                       # [1, C]
    inv_norm = jax.lax.rsqrt(jnp.sum(p * p) + 1e-16)
    score = jnp.tanh(jnp.sum(X * p, axis=-1) * inv_norm)       # [N]
    top_vals, perm = jax.lax.top_k(score, C)
    # TODO(synk): top_k + data-dependent row gather stay in XLA (no Pallas sort/gather).
    x_tilde = X[perm, :] * top_vals[:, None]                   # [C, C]

    # --- padded sizes: lane-dense channels, tileable node dim ---
    Cp = _round_up(C, 128)
    Np = _round_up(N, 256) if N > 256 else _round_up(N, 8)

    # --- dense A-hat (f32 accumulate -> bf16 stream) and D^{-1/2} ---
    # TODO(synk): edge_index -> dense adjacency scatter stays in XLA (O(E) scatter).
    src, dst = edge_index[0], edge_index[1]
    if edge_weight is None:
        edge_weight = jnp.ones(src.shape, jnp.float32)
    edge_weight = edge_weight.astype(jnp.float32)
    fill = 2.0 if improved else 1.0
    a = jnp.zeros((Np, Np), jnp.float32).at[dst, src].add(edge_weight)
    if add_self_loops:
        diag = jnp.arange(N)
        a = a.at[diag, diag].add(fill)
    deg = jnp.sum(a, axis=1)                                   # [Np]
    dis = jnp.where(deg > 0.0, jax.lax.rsqrt(deg), 0.0)[:, None]   # [Np, 1]
    a_bf16 = a.astype(jnp.bfloat16)

    # --- pad & pack kernel operands (zero padding keeps semantics exact) ---
    x_tilde_p = _pad2d(x_tilde, Cp, Cp)
    h_p = _pad2d(params["initial_weight"][0], Cp, Cp)
    wiT_p = _pad_gates_T(params["gru_w_ih"], C, Cp)            # [Cp, 3Cp]
    whT_p = _pad_gates_T(params["gru_w_hh"], C, Cp)            # [Cp, 3Cp]
    bi_p = _pad_gate_bias(params["gru_b_ih"], C, Cp)           # [1, 3Cp]
    bh_p = _pad_gate_bias(params["gru_b_hh"], C, Cp)           # [1, 3Cp]
    x_p = _pad2d(X, Np, Cp).astype(jnp.bfloat16)               # [Np, Cp]

    out_p, w_p = _fused_evolvegcnh(x_tilde_p, h_p, wiT_p, whT_p, bi_p, bh_p,
                                   x_p, dis, a_bf16)
    return out_p[:N, :C], w_p[:C, :C]


def init_params(key, num_of_nodes, in_channels):
    C = in_channels
    ks = jax.random.split(key, 6)
    glorot = math.sqrt(6.0 / (C + C))
    u = 1.0 / math.sqrt(C)
    return {
        "initial_weight": jax.random.uniform(ks[0], (1, C, C), jnp.float32,
                                             -glorot, glorot),
        "pool_p": jax.random.uniform(ks[1], (1, C), jnp.float32, -u, u),
        # PyTorch GRU layout: [3C, C] with gates stacked (r, z, n).
        "gru_w_ih": jax.random.uniform(ks[2], (3 * C, C), jnp.float32, -u, u),
        "gru_w_hh": jax.random.uniform(ks[3], (3 * C, C), jnp.float32, -u, u),
        "gru_b_ih": jax.random.uniform(ks[4], (3 * C,), jnp.float32, -u, u),
        "gru_b_hh": jax.random.uniform(ks[5], (3 * C,), jnp.float32, -u, u),
    }


# ---------------------------------------------------------------------------
# Pure-JAX reference (f32 end-to-end) for a loose numerical check.
# ---------------------------------------------------------------------------
def _reference(params, X, edge_index):
    N, C = X.shape
    p = params["pool_p"]
    score = jnp.tanh(jnp.sum(X * p, axis=-1) / jnp.sqrt(jnp.sum(p * p)))
    vals, perm = jax.lax.top_k(score, C)
    x_tilde = X[perm] * vals[:, None]
    h = params["initial_weight"][0]
    gi = x_tilde @ params["gru_w_ih"].T + params["gru_b_ih"]
    gh = h @ params["gru_w_hh"].T + params["gru_b_hh"]
    r = jax.nn.sigmoid(gi[:, :C] + gh[:, :C])
    z = jax.nn.sigmoid(gi[:, C:2 * C] + gh[:, C:2 * C])
    n = jnp.tanh(gi[:, 2 * C:] + r * gh[:, 2 * C:])
    W = (1.0 - z) * n + z * h
    src, dst = edge_index[0], edge_index[1]
    a = jnp.zeros((N, N), jnp.float32).at[dst, src].add(1.0) + jnp.eye(N)
    deg = a.sum(1)
    dis = jnp.where(deg > 0, 1.0 / jnp.sqrt(deg), 0.0)
    a_norm = dis[:, None] * a * dis[None, :]
    return a_norm @ (X @ W), W


if __name__ == "__main__":
    N = 16        # num_of_nodes
    C = 8         # in_channels  (ratio = 8/16 -> top-k keeps 8 nodes)

    key = jax.random.PRNGKey(0)
    k_x, k_p = jax.random.split(key)
    X = jax.random.normal(k_x, (N, C), jnp.float32)

    # deterministic ring graph (both directions)
    idx = jnp.arange(N, dtype=jnp.int32)
    src = jnp.concatenate([idx, (idx + 1) % N])
    dst = jnp.concatenate([(idx + 1) % N, idx])
    edge_index = jnp.stack([src, dst], axis=0)                  # [2, 2N]

    params = init_params(k_p, N, C)

    fwd = jax.jit(evolve_gcn_h_forward)
    out, W_evolved = fwd(params, X, edge_index, None)
    out = jax.block_until_ready(out)
    W_evolved = jax.block_until_ready(W_evolved)

    assert out.shape == (N, C) and out.dtype == jnp.float32
    assert W_evolved.shape == (C, C)
    assert bool(jnp.all(jnp.isfinite(out)))
    assert bool(jnp.all(jnp.isfinite(W_evolved)))

    # loose check vs f32 reference (kernel streams A / XW in bf16)
    out_ref, W_ref = _reference(params, X, edge_index)
    assert bool(jnp.allclose(W_evolved, W_ref, rtol=5e-2, atol=5e-2))
    assert bool(jnp.allclose(out, out_ref, rtol=5e-2, atol=5e-2))

    print("KERNEL_OK")
</pallas_src>

<mosaic_0001>
module attributes {stable_mosaic.version = 11 : i64} {
  func.func @_gru_xw_kernel(%arg0: memref<128x128xf32, #tpu.memory_space<vmem>>, %arg1: memref<128x128xf32, #tpu.memory_space<vmem>>, %arg2: memref<128x384xf32, #tpu.memory_space<vmem>>, %arg3: memref<128x384xf32, #tpu.memory_space<vmem>>, %arg4: memref<1x384xf32, #tpu.memory_space<vmem>>, %arg5: memref<1x384xf32, #tpu.memory_space<vmem>>, %arg6: memref<16x128xbf16, #tpu.memory_space<vmem>>, %arg7: memref<16x1xf32, #tpu.memory_space<vmem>>, %arg8: memref<128x128xf32, #tpu.memory_space<vmem>>, %arg9: memref<16x128xbf16, #tpu.memory_space<vmem>>) attributes {dimension_semantics = [], scalar_prefetch = 0 : i64, scratch_operands = 0 : i64, tpu.core_type = #tpu.core_type<tc>} {
    %c0 = arith.constant 0 : index
    %c0_0 = arith.constant 0 : index
    %0 = vector.load %arg0[%c0, %c0_0] : memref<128x128xf32, #tpu.memory_space<vmem>>, vector<128x128xf32>
    %c0_1 = arith.constant 0 : index
    %c0_2 = arith.constant 0 : index
    %1 = vector.load %arg1[%c0_1, %c0_2] : memref<128x128xf32, #tpu.memory_space<vmem>>, vector<128x128xf32>
    %c0_3 = arith.constant 0 : index
    %c0_4 = arith.constant 0 : index
    %2 = vector.load %arg2[%c0_3, %c0_4] : memref<128x384xf32, #tpu.memory_space<vmem>>, vector<128x384xf32>
    %cst = arith.constant dense<0.000000e+00> : vector<128x384xf32>
    %3 = tpu.matmul %0, %2, %cst {dimension_numbers = #tpu.dot_dimension_numbers<[1], [0], [0], [1], [0, 0, 1, 1], [], []>} : vector<128x128xf32>, vector<128x384xf32>, vector<128x384xf32> -> vector<128x384xf32>
    %c0_5 = arith.constant 0 : index
    %c0_6 = arith.constant 0 : index
    %4 = vector.load %arg4[%c0_5, %c0_6] : memref<1x384xf32, #tpu.memory_space<vmem>>, vector<1x384xf32>
    %5 = vector.broadcast %4 : vector<1x384xf32> to vector<128x384xf32>
    %6 = arith.addf %3, %5 : vector<128x384xf32>
    %c0_7 = arith.constant 0 : index
    %c0_8 = arith.constant 0 : index
    %7 = vector.load %arg3[%c0_7, %c0_8] : memref<128x384xf32, #tpu.memory_space<vmem>>, vector<128x384xf32>
    %cst_9 = arith.constant dense<0.000000e+00> : vector<128x384xf32>
    %8 = tpu.matmul %1, %7, %cst_9 {dimension_numbers = #tpu.dot_dimension_numbers<[1], [0], [0], [1], [0, 0, 1, 1], [], []>} : vector<128x128xf32>, vector<128x384xf32>, vector<128x384xf32> -> vector<128x384xf32>
    %c0_10 = arith.constant 0 : index
    %c0_11 = arith.constant 0 : index
    %9 = vector.load %arg5[%c0_10, %c0_11] : memref<1x384xf32, #tpu.memory_space<vmem>>, vector<1x384xf32>
    %10 = vector.broadcast %9 : vector<1x384xf32> to vector<128x384xf32>
    %11 = arith.addf %8, %10 : vector<128x384xf32>
    %12 = vector.extract_strided_slice %6 {offsets = [0, 0], sizes = [128, 128], strides = [1, 1]} : vector<128x384xf32> to vector<128x128xf32>
    %13 = vector.extract_strided_slice %11 {offsets = [0, 0], sizes = [128, 128], strides = [1, 1]} : vector<128x384xf32> to vector<128x128xf32>
    %14 = arith.addf %12, %13 : vector<128x128xf32>
    %15 = arith.negf %14 : vector<128x128xf32>
    %16 = math.exp %15 : vector<128x128xf32>
    %cst_12 = arith.constant 1.000000e+00 : f32
    %17 = vector.broadcast %cst_12 : f32 to vector<128x128xf32>
    %18 = arith.addf %17, %16 : vector<128x128xf32>
    %19 = arith.divf %17, %18 : vector<128x128xf32>
    %20 = vector.extract_strided_slice %6 {offsets = [0, 128], sizes = [128, 128], strides = [1, 1]} : vector<128x384xf32> to vector<128x128xf32>
    %21 = vector.extract_strided_slice %11 {offsets = [0, 128], sizes = [128, 128], strides = [1, 1]} : vector<128x384xf32> to vector<128x128xf32>
    %22 = arith.addf %20, %21 : vector<128x128xf32>
    %23 = arith.negf %22 : vector<128x128xf32>
    %24 = math.exp %23 : vector<128x128xf32>
    %cst_13 = arith.constant 1.000000e+00 : f32
    %25 = vector.broadcast %cst_13 : f32 to vector<128x128xf32>
    %26 = arith.addf %25, %24 : vector<128x128xf32>
    %27 = arith.divf %25, %26 : vector<128x128xf32>
    %28 = vector.extract_strided_slice %6 {offsets = [0, 256], sizes = [128, 128], strides = [1, 1]} : vector<128x384xf32> to vector<128x128xf32>
    %29 = vector.extract_strided_slice %11 {offsets = [0, 256], sizes = [128, 128], strides = [1, 1]} : vector<128x384xf32> to vector<128x128xf32>
    %30 = arith.mulf %19, %29 : vector<128x128xf32>
    %31 = arith.addf %28, %30 : vector<128x128xf32>
    %32 = math.tanh %31 : vector<128x128xf32>
    %cst_14 = arith.constant 1.000000e+00 : f32
    %33 = vector.broadcast %cst_14 : f32 to vector<128x128xf32>
    %34 = arith.subf %33, %27 : vector<128x128xf32>
    %35 = arith.mulf %34, %32 : vector<128x128xf32>
    %36 = arith.mulf %27, %1 : vector<128x128xf32>
    %37 = arith.addf %35, %36 : vector<128x128xf32>
    %c0_15 = arith.constant 0 : index
    %c0_16 = arith.constant 0 : index
    %38 = vector.load %arg8[%c0_15, %c0_16] : memref<128x128xf32, #tpu.memory_space<vmem>>, vector<128x128xf32>
    tpu.vector_store %arg8[%c0_15, %c0_16], %37 {strides = array<i32>} : memref<128x128xf32, #tpu.memory_space<vmem>>, vector<128x128xf32>,
    %c0_17 = arith.constant 0 : index
    %c0_18 = arith.constant 0 : index
    %39 = vector.load %arg6[%c0_17, %c0_18] : memref<16x128xbf16, #tpu.memory_space<vmem>>, vector<16x128xbf16>
    %40 = arith.truncf %37 : vector<128x128xf32> to vector<128x128xbf16>
    %cst_19 = arith.constant dense<0.000000e+00> : vector<16x128xf32>
    %41 = tpu.matmul %39, %40, %cst_19 {dimension_numbers = #tpu.dot_dimension_numbers<[1], [0], [0], [1], [0, 0, 1, 1], [], []>} : vector<16x128xbf16>, vector<128x128xbf16>, vector<16x128xf32> -> vector<16x128xf32>
    %c0_20 = arith.constant 0 : index
    %c0_21 = arith.constant 0 : index
    %42 = vector.load %arg7[%c0_20, %c0_21] : memref<16x1xf32, #tpu.memory_space<vmem>>, vector<16x1xf32>
    %43 = vector.broadcast %42 : vector<16x1xf32> to vector<16x128xf32>
    %44 = arith.mulf %43, %41 : vector<16x128xf32>
    %45 = arith.truncf %44 : vector<16x128xf32> to vector<16x128xbf16>
    %c0_22 = arith.constant 0 : index
    %c0_23 = arith.constant 0 : index
    %46 = vector.load %arg9[%c0_22, %c0_23] : memref<16x128xbf16, #tpu.memory_space<vmem>>, vector<16x128xbf16>
    tpu.vector_store %arg9[%c0_22, %c0_23], %45 {strides = array<i32>} : memref<16x128xbf16, #tpu.memory_space<vmem>>, vector<16x128xbf16>,
    return
  }
}

module attributes {stable_mosaic.version = 11 : i64} {
  func.func @_spmm_kernel(%arg0: i32, %arg1: i32, %arg2: memref<16x16xbf16, #tpu.memory_space<vmem>>, %arg3: memref<16x128xbf16, #tpu.memory_space<vmem>>, %arg4: memref<16x1xf32, #tpu.memory_space<vmem>>, %arg5: memref<16x128xf32, #tpu.memory_space<vmem>>) attributes {dimension_semantics = [#tpu.dimension_semantics<parallel>, #tpu.dimension_semantics<arbitrary>], iteration_bounds = array<i64: 1, 1>, scalar_prefetch = 0 : i64, scratch_operands = 0 : i64, tpu.core_type = #tpu.core_type<tc>, window_params = [{transform_indices = @transform_0, window_bounds = array<i64: 16, 16>}, {transform_indices = @transform_1, window_bounds = array<i64: 16, 128>}, {transform_indices = @transform_2, window_bounds = array<i64: 16, 1>}, {transform_indices = @transform_3, window_bounds = array<i64: 16, 128>}]} {
    %c0_i32 = arith.constant 0 : i32
    %0 = arith.cmpi eq, %arg1, %c0_i32 : i32
    %1 = arith.extui %0 : i1 to i32
    %c0_i32_0 = arith.constant 0 : i32
    %2 = arith.cmpi ne, %1, %c0_i32_0 : i32
    scf.if %2 {
      %cst_10 = arith.constant 0.000000e+00 : f32
      %12 = vector.broadcast %cst_10 : f32 to vector<16x128xf32>
      %c0_11 = arith.constant 0 : index
      %c0_12 = arith.constant 0 : index
      %13 = vector.load %arg5[%c0_11, %c0_12] : memref<16x128xf32, #tpu.memory_space<vmem>>, vector<16x128xf32>
      tpu.vector_store %arg5[%c0_11, %c0_12], %12 {strides = array<i32>} : memref<16x128xf32, #tpu.memory_space<vmem>>, vector<16x128xf32>,
    } else {
    }
    %c0 = arith.constant 0 : index
    %c0_1 = arith.constant 0 : index
    %3 = vector.load %arg5[%c0, %c0_1] : memref<16x128xf32, #tpu.memory_space<vmem>>, vector<16x128xf32>
    %c0_2 = arith.constant 0 : index
    %c0_3 = arith.constant 0 : index
    %4 = vector.load %arg2[%c0_2, %c0_3] : memref<16x16xbf16, #tpu.memory_space<vmem>>, vector<16x16xbf16>
    %c0_4 = arith.constant 0 : index
    %c0_5 = arith.constant 0 : index
    %5 = vector.load %arg3[%c0_4, %c0_5] : memref<16x128xbf16, #tpu.memory_space<vmem>>, vector<16x128xbf16>
    %cst = arith.constant dense<0.000000e+00> : vector<16x128xf32>
    %6 = tpu.matmul %4, %5, %cst {dimension_numbers = #tpu.dot_dimension_numbers<[1], [0], [0], [1], [0, 0, 1, 1], [], []>} : vector<16x16xbf16>, vector<16x128xbf16>, vector<16x128xf32> -> vector<16x128xf32>
    %7 = arith.addf %3, %6 : vector<16x128xf32>
    %c0_6 = arith.constant 0 : index
    %c0_7 = arith.constant 0 : index
    %8 = vector.load %arg5[%c0_6, %c0_7] : memref<16x128xf32, #tpu.memory_space<vmem>>, vector<16x128xf32>
    tpu.vector_store %arg5[%c0_6, %c0_7], %7 {strides = array<i32>} : memref<16x128xf32, #tpu.memory_space<vmem>>, vector<16x128xf32>,
    %c0_i32_8 = arith.constant 0 : i32
    %9 = arith.cmpi eq, %arg1, %c0_i32_8 : i32
    %10 = arith.extui %9 : i1 to i32
    %c0_i32_9 = arith.constant 0 : i32
    %11 = arith.cmpi ne, %10, %c0_i32_9 : i32
    scf.if %11 {
      %c0_10 = arith.constant 0 : index
      %c0_11 = arith.constant 0 : index
      %12 = vector.load %arg4[%c0_10, %c0_11] : memref<16x1xf32, #tpu.memory_space<vmem>>, vector<16x1xf32>
      %c0_12 = arith.constant 0 : index
      %c0_13 = arith.constant 0 : index
      %13 = vector.load %arg5[%c0_12, %c0_13] : memref<16x128xf32, #tpu.memory_space<vmem>>, vector<16x128xf32>
      %14 = vector.broadcast %12 : vector<16x1xf32> to vector<16x128xf32>
      %15 = arith.mulf %14, %13 : vector<16x128xf32>
      %c0_14 = arith.constant 0 : index
      %c0_15 = arith.constant 0 : index
      %16 = vector.load %arg5[%c0_14, %c0_15] : memref<16x128xf32, #tpu.memory_space<vmem>>, vector<16x128xf32>
      tpu.vector_store %arg5[%c0_14, %c0_15], %15 {strides = array<i32>} : memref<16x128xf32, #tpu.memory_space<vmem>>, vector<16x128xf32>,
    } else {
    }
    return
  }
  func.func @transform_0(%arg0: i32, %arg1: i32) -> (i32, i32) {
    %c0_i32 = arith.constant 0 : i32
    return %arg0, %arg1 : i32, i32
  }
  func.func @transform_1(%arg0: i32, %arg1: i32) -> (i32, i32) {
    %c0_i32 = arith.constant 0 : i32
    %c0_i32_0 = arith.constant 0 : i32
    return %arg1, %c0_i32 : i32, i32
  }
  func.func @transform_2(%arg0: i32, %arg1: i32) -> (i32, i32) {
    %c0_i32 = arith.constant 0 : i32
    %c0_i32_0 = arith.constant 0 : i32
    return %arg0, %c0_i32 : i32, i32
  }
  func.func @transform_3(%arg0: i32, %arg1: i32) -> (i32, i32) {
    %c0_i32 = arith.constant 0 : i32
    %c0_i32_0 = arith.constant 0 : i32
    return %arg0, %c0_i32 : i32, i32
  }
}

</mosaic_0001>

<bundles_post_ra>
// kernel: evolve_gcn_h_forward.3
= control target key start
LH: loop header
LB: loop body
LE: loop exit
PB: predicated region body
PF: predicated region fallthrough
CT: control target
= control target key end

     0   :  { %v99_v1 = vmov 0   ;;  %vm38_vm0 = vcmask 130048   ;;  %s138_s1 = inlined_call_operand.vmem [shape: bf16[16,128], index: 1, kind: input, shape index: {}]   ;;  %s139_s0 = inlined_call_operand.vmem [shape: bf16[16,16], index: 0, kind: input, shape index: {}]   ;;  %s140_s2 = inlined_call_operand.vmem [shape: f32[16,1], index: 2, kind: input, shape index: {}]   ;;  %s141_s3 = inlined_call_operand.vmem [shape: f32[16,128], index: 3, kind: output, shape index: {}]  }
   0x1   :  { %v95_v0 = vld [vmem:[%s138_s1] sm:$0xff]  ;;  %98 = vset.pattern.permute.xlu0 %v99_v1  ;;  %v64_v4 = vld [vmem:[%s140_s2 + $0x8] sm:$0xff] }
   0x2   :  { %v63_v2 = vld [vmem:[%s140_s2] sm:$0xff]  ;;  %49 = vmatpush.bf16.msra.mxu0 %v95_v0 }
   0x3   :  { %v94_v3 = vld [vmem:[%s139_s0] sm:$0xff]  ;;  %69 = vperm.xlu0 %98, %v63_v2  }
   0x5   :  { %93 = vmatmul.msk.bf16.vlgmr.msra.gmra.mxu0 %vm38_vm0, %v94_v3 }
   0xb   :  { %74 = vperm.xlu0 %98, %v64_v4  }
  0x75   :  { %v70_v6 = vpop.permute.xlu0 %69 }
  0x7d   :  { %v75_v9 = vpop.permute.xlu0 %74 }
  0x82   :  { %v51_v5 = vpop.f32.mrf.mxu0 }
  0x83   :  { %v77_v7 = vmul.f32 %v70_v6, %v51_v5 }
  0x85   :  { %79 = vst [vmem:[%s141_s3] sm:$0xff] %v77_v7 }
  0x8a   :  { %v53_v8 = vpop.f32.mrf.mxu0 }
  0x8b   :  { %v78_v10 = vmul.f32 %v75_v9, %v53_v8 }
  0x8d   :  { %80 = vst [vmem:[%s141_s3 + $0x8] sm:$0xff] %v78_v10 }

// kernel: evolve_gcn_h_forward.2
= control target key start
LH: loop header
LB: loop body
LE: loop exit
PB: predicated region body
PF: predicated region fallthrough
CT: control target
= control target key end

     0   :  { %s3395_s2 = inlined_call_operand.vmem [shape: f32[128,384], index: 2, kind: input, shape index: {}]   ;;  %s3396_s0 = inlined_call_operand.vmem [shape: f32[128,128], index: 0, kind: input, shape index: {}]   ;;  %s3397_s3 = inlined_call_operand.vmem [shape: f32[128,384], index: 3, kind: input, shape index: {}]   ;;  %s3398_s1 = inlined_call_operand.vmem [shape: f32[128,128], index: 1, kind: input, shape index: {}]   ;;  %s3399_s4 = inlined_call_operand.vmem [shape: f32[1,384], index: 4, kind: input, shape index: {}]   ;;  %s3400_s5 = inlined_call_operand.vmem [shape: f32[1,384], index: 5, kind: input, shape index: {}]   ;;  %s3401_s8 = inlined_call_operand.vmem [shape: f32[128,128], index: 8, kind: output, shape index: {0}]   ;;  %s3402_s7 = inlined_call_operand.vmem [shape: f32[16,1], index: 7, kind: input, shape index: {}]   ;;  %s3403_s6 = inlined_call_operand.vmem [shape: bf16[16,128], index: 6, kind: input, shape index: {}]   ;;  %s3404_s9 = inlined_call_operand.vmem [shape: bf16[16,128], index: 9, kind: output, shape index: {1}]  }
   0x1   :  { %v108_v0 = vld [vmem:[%s3395_s2 + $0x168] sm:$0xff]  ;;  %v105_v1 = vld [vmem:[%s3395_s2 + $0x150] sm:$0xff]  ;;  %v102_v2 = vld [vmem:[%s3395_s2 + $0x138] sm:$0xff] }
   0x2   :  { %119 = vmatpush.msra.mxu0 %v108_v0  ;;  %1431 = vmatpush.msra.mxu3 %v108_v0  ;;  %v109_v3 = vld [vmem:[%s3395_s2 + $0x170] sm:$0xff]  ;;  %v99_v4 = vld [vmem:[%s3395_s2 + $0x120] sm:$0xff]  ;;  %v106_v5 = vld [vmem:[%s3395_s2 + $0x158] sm:$0xff] }
   0x3   :  { %184 = vmatpush.msra.mxu1 %v109_v3  ;;  %1447 = vmatpush.msra.mxu2 %v109_v3  ;;  %v103_v6 = vld [vmem:[%s3395_s2 + $0x140] sm:$0xff]  ;;  %v96_v7 = vld [vmem:[%s3395_s2 + $0x108] sm:$0xff]  ;;  %v93_v9 = vld [vmem:[%s3395_s2 + $0xf0] sm:$0xff] }
   0x4   :  { %120 = vmatpush.msra.mxu0 %v105_v1  ;;  %1432 = vmatpush.msra.mxu3 %v105_v1  ;;  %v100_v8 = vld [vmem:[%s3395_s2 + $0x128] sm:$0xff]  ;;  %v97_v10 = vld [vmem:[%s3395_s2 + $0x110] sm:$0xff]  ;;  %v90_v11 = vld [vmem:[%s3395_s2 + $0xd8] sm:$0xff] }
   0x5   :  { %185 = vmatpush.msra.mxu1 %v106_v5  ;;  %1448 = vmatpush.msra.mxu2 %v106_v5  ;;  %v94_v12 = vld [vmem:[%s3395_s2 + $0xf8] sm:$0xff]  ;;  %v87_v13 = vld [vmem:[%s3395_s2 + $0xc0] sm:$0xff]  ;;  %v84_v15 = vld [vmem:[%s3395_s2 + $0xa8] sm:$0xff] }
   0x6   :  { %121 = vmatpush.msra.mxu0 %v102_v2  ;;  %1433 = vmatpush.msra.mxu3 %v102_v2  ;;  %v91_v14 = vld [vmem:[%s3395_s2 + $0xe0] sm:$0xff]  ;;  %v88_v16 = vld [vmem:[%s3395_s2 + $0xc8] sm:$0xff]  ;;  %v81_v17 = vld [vmem:[%s3395_s2 + $0x90] sm:$0xff] }
   0x7   :  { %186 = vmatpush.msra.mxu1 %v103_v6  ;;  %1449 = vmatpush.msra.mxu2 %v103_v6  ;;  %v85_v18 = vld [vmem:[%s3395_s2 + $0xb0] sm:$0xff]  ;;  %v78_v19 = vld [vmem:[%s3395_s2 + $0x78] sm:$0xff]  ;;  %v75_v21 = vld [vmem:[%s3395_s2 + $0x60] sm:$0xff] }
   0x8   :  { %122 = vmatpush.msra.mxu0 %v99_v4  ;;  %1434 = vmatpush.msra.mxu3 %v99_v4  ;;  %v82_v20 = vld [vmem:[%s3395_s2 + $0x98] sm:$0xff]  ;;  %v79_v22 = vld [vmem:[%s3395_s2 + $0x80] sm:$0xff]  ;;  %v72_v23 = vld [vmem:[%s3395_s2 + $0x48] sm:$0xff] }
   0x9   :  { %187 = vmatpush.msra.mxu1 %v100_v8  ;;  %1450 = vmatpush.msra.mxu2 %v100_v8  ;;  %v76_v24 = vld [vmem:[%s3395_s2 + $0x68] sm:$0xff]  ;;  %v69_v25 = vld [vmem:[%s3395_s2 + $0x30] sm:$0xff]  ;;  %v66_v27 = vld [vmem:[%s3395_s2 + $0x18] sm:$0xff] }
   0xa   :  { %123 = vmatpush.msra.mxu0 %v96_v7  ;;  %1435 = vmatpush.msra.mxu3 %v96_v7  ;;  %v73_v26 = vld [vmem:[%s3395_s2 + $0x50] sm:$0xff]  ;;  %v70_v28 = vld [vmem:[%s3395_s2 + $0x38] sm:$0xff]  ;;  %v63_v29 = vld [vmem:[%s3395_s2] sm:$0xff] }
   0xb   :  { %188 = vmatpush.msra.mxu1 %v97_v10  ;;  %1451 = vmatpush.msra.mxu2 %v97_v10  ;;  %v1785_v30 = vld [vmem:[%s3396_s0] sm:$0xff]  ;;  %v1790_v31 = vld [vmem:[%s3396_s0 + $0x48] sm:$0xff]  ;;  %v356_v35 = vld [vmem:[%s3397_s3 + $0x150] sm:$0xff] }
   0xc   :  { %124 = vmatpush.msra.mxu0 %v93_v9  ;;  %1436 = vmatpush.msra.mxu3 %v93_v9  ;;  %v67_v32 = vld [vmem:[%s3395_s2 + $0x20] sm:$0xff]  ;;  %v359_v33 = vld [vmem:[%s3397_s3 + $0x168] sm:$0xff]  ;;  %v353_v36 = vld [vmem:[%s3397_s3 + $0x138] sm:$0xff] }
   0xd   :  { %189 = vmatpush.msra.mxu1 %v94_v12  ;;  %1452 = vmatpush.msra.mxu2 %v94_v12  ;;  %v64_v34 = vld [vmem:[%s3395_s2 + $0x8] sm:$0xff]  ;;  %v350_v37 = vld [vmem:[%s3397_s3 + $0x120] sm:$0xff]  ;;  %v1821_v39 = vld [vmem:[%s3396_s0 + $0x50] sm:$0xff] }
   0xe   :  { %125 = vmatpush.msra.mxu0 %v90_v11  ;;  %1437 = vmatpush.msra.mxu3 %v90_v11  ;;  %v1816_v38 = vld [vmem:[%s3396_s0 + $0x8] sm:$0xff]  ;;  %v344_v41 = vld [vmem:[%s3397_s3 + $0xf0] sm:$0xff]  ;;  %v357_v43 = vld [vmem:[%s3397_s3 + $0x158] sm:$0xff] }
   0xf   :  { %190 = vmatpush.msra.mxu1 %v91_v14  ;;  %1453 = vmatpush.msra.mxu2 %v91_v14  ;;  %v347_v40 = vld [vmem:[%s3397_s3 + $0x108] sm:$0xff]  ;;  %v360_v42 = vld [vmem:[%s3397_s3 + $0x170] sm:$0xff]  ;;  %v341_v44 = vld [vmem:[%s3397_s3 + $0xd8] sm:$0xff] }
  0x10   :  { %126 = vmatpush.msra.mxu0 %v87_v13  ;;  %1438 = vmatpush.msra.mxu3 %v87_v13  ;;  %v354_v45 = vld [vmem:[%s3397_s3 + $0x140] sm:$0xff]  ;;  %v1851_v47 = vld [vmem:[%s3396_s0 + $0x10] sm:$0xff]  ;;  %v1856_v48 = vld [vmem:[%s3396_s0 + $0x58] sm:$0xff] }
  0x11   :  { %191 = vmatpush.msra.mxu1 %v88_v16  ;;  %1454 = vmatpush.msra.mxu2 %v88_v16  ;;  %v338_v46 = vld [vmem:[%s3397_s3 + $0xc0] sm:$0xff]  ;;  %v335_v49 = vld [vmem:[%s3397_s3 + $0xa8] sm:$0xff]  ;;  %v332_v51 = vld [vmem:[%s3397_s3 + $0x90] sm:$0xff] }
  0x12   :  { %127 = vmatpush.msra.mxu0 %v84_v15  ;;  %1439 = vmatpush.msra.mxu3 %v84_v15  ;;  %v351_v50 = vld [vmem:[%s3397_s3 + $0x128] sm:$0xff]  ;;  %v348_v52 = vld [vmem:[%s3397_s3 + $0x110] sm:$0xff]  ;;  %v329_v53 = vld [vmem:[%s3397_s3 + $0x78] sm:$0xff] }
  0x13   :  { %192 = vmatpush.msra.mxu1 %v85_v18  ;;  %1455 = vmatpush.msra.mxu2 %v85_v18  ;;  %v345_v54 = vld [vmem:[%s3397_s3 + $0xf8] sm:$0xff]  ;;  %v326_v55 = vld [vmem:[%s3397_s3 + $0x60] sm:$0xff]  ;;  %v323_v58 = vld [vmem:[%s3397_s3 + $0x48] sm:$0xff] }
  0x14   :  { %128 = vmatpush.msra.mxu0 %v81_v17  ;;  %1440 = vmatpush.msra.mxu3 %v81_v17  ;;  %v1886_v56 = vld [vmem:[%s3396_s0 + $0x18] sm:$0xff]  ;;  %v1891_v57 = vld [vmem:[%s3396_s0 + $0x60] sm:$0xff]  ;;  %v320_v60 = vld [vmem:[%s3397_s3 + $0x30] sm:$0xff] }
  0x15   :  { %193 = vmatpush.msra.mxu1 %v82_v20  ;;  %1456 = vmatpush.msra.mxu2 %v82_v20  ;;  %v342_v59 = vld [vmem:[%s3397_s3 + $0xe0] sm:$0xff]  ;;  %v339_v61 = vld [vmem:[%s3397_s3 + $0xc8] sm:$0xff]  ;;  %v110_v62 = vld [vmem:[%s3395_s2 + $0x178] sm:$0xff] }
  0x16   :  { %129 = vmatpush.msra.mxu0 %v78_v19  ;;  %1441 = vmatpush.msra.mxu3 %v78_v19  ;;  %v107_v63 = vld [vmem:[%s3395_s2 + $0x160] sm:$0xff]  ;;  %v317_v0 = vld [vmem:[%s3397_s3 + $0x18] sm:$0xff]  ;;  %v336_v1 = vld [vmem:[%s3397_s3 + $0xb0] sm:$0xff] }
  0x17   :  { %194 = vmatpush.msra.mxu1 %v79_v22  ;;  %1457 = vmatpush.msra.mxu2 %v79_v22  ;;  %v104_v2 = vld [vmem:[%s3395_s2 + $0x148] sm:$0xff]  ;;  %v314_v3 = vld [vmem:[%s3397_s3] sm:$0xff]  ;;  %v361_v4 = vld [vmem:[%s3397_s3 + $0x178] sm:$0xff] }
  0x18   :  { %130 = vmatpush.msra.mxu0 %v75_v21  ;;  %1442 = vmatpush.msra.mxu3 %v75_v21  ;;  %v1933_v5 = vld [vmem:[%s3396_s0 + $0x20] sm:$0xff]  ;;  %v1938_v6 = vld [vmem:[%s3396_s0 + $0x68] sm:$0xff]  ;;  %v333_v7 = vld [vmem:[%s3397_s3 + $0x98] sm:$0xff] }
  0x19   :  { %195 = vmatpush.msra.mxu1 %v76_v24  ;;  %1458 = vmatpush.msra.mxu2 %v76_v24  ;;  %v101_v8 = vld [vmem:[%s3395_s2 + $0x130] sm:$0xff]  ;;  %v358_v9 = vld [vmem:[%s3397_s3 + $0x160] sm:$0xff]  ;;  %v98_v11 = vld [vmem:[%s3395_s2 + $0x118] sm:$0xff] }
  0x1a   :  { %131 = vmatpush.msra.mxu0 %v72_v23  ;;  %1443 = vmatpush.msra.mxu3 %v72_v23  ;;  %v330_v10 = vld [vmem:[%s3397_s3 + $0x80] sm:$0xff]  ;;  %v327_v12 = vld [vmem:[%s3397_s3 + $0x68] sm:$0xff]  ;;  %v324_v15 = vld [vmem:[%s3397_s3 + $0x50] sm:$0xff] }
  0x1b   :  { %196 = vmatpush.msra.mxu1 %v73_v26  ;;  %1459 = vmatpush.msra.mxu2 %v73_v26  ;;  %v355_v13 = vld [vmem:[%s3397_s3 + $0x148] sm:$0xff]  ;;  %v95_v14 = vld [vmem:[%s3395_s2 + $0x100] sm:$0xff]  ;;  %v1979_v17 = vld [vmem:[%s3396_s0 + $0x70] sm:$0xff] }
  0x1c   :  { %132 = vmatpush.msra.mxu0 %v69_v25  ;;  %1444 = vmatpush.msra.mxu3 %v69_v25  ;;  %v1974_v16 = vld [vmem:[%s3396_s0 + $0x28] sm:$0xff]  ;;  %v321_v18 = vld [vmem:[%s3397_s3 + $0x38] sm:$0xff]  ;;  %v352_v19 = vld [vmem:[%s3397_s3 + $0x130] sm:$0xff] }
  0x1d   :  { %197 = vmatpush.msra.mxu1 %v70_v28  ;;  %1460 = vmatpush.msra.mxu2 %v70_v28  ;;  %v92_v20 = vld [vmem:[%s3395_s2 + $0xe8] sm:$0xff]  ;;  %v318_v21 = vld [vmem:[%s3397_s3 + $0x20] sm:$0xff]  ;;  %v349_v22 = vld [vmem:[%s3397_s3 + $0x118] sm:$0xff] }
  0x1e   :  { %133 = vmatpush.msra.mxu0 %v66_v27  ;;  %1445 = vmatpush.msra.mxu3 %v66_v27  ;;  %v89_v23 = vld [vmem:[%s3395_s2 + $0xd0] sm:$0xff]  ;;  %v315_v24 = vld [vmem:[%s3397_s3 + $0x8] sm:$0xff]  ;;  %v346_v25 = vld [vmem:[%s3397_s3 + $0x100] sm:$0xff] }
  0x1f   :  { %198 = vmatpush.msra.mxu1 %v67_v32  ;;  %1461 = vmatpush.msra.mxu2 %v67_v32  ;;  %v86_v26 = vld [vmem:[%s3395_s2 + $0xb8] sm:$0xff]  ;;  %v343_v27 = vld [vmem:[%s3397_s3 + $0xe8] sm:$0xff]  ;;  %v2018_v28 = vld [vmem:[%s3396_s0 + $0x30] sm:$0xff] }
  0x20   :  { %134 = vmatpush.msra.mxu0 %v63_v29  ;;  %1446 = vmatpush.msra.mxu3 %v63_v29  ;;  %v2023_v29 = vld [vmem:[%s3396_s0 + $0x78] sm:$0xff]  ;;  %v83_v32 = vld [vmem:[%s3395_s2 + $0xa0] sm:$0xff] }
  0x21   :  { %135 = vmatmul.f32.vlgmr.msra.gmra.mxu0 %v1785_v30  ;;  %162 = vmatmul.f32.vlgmr.msra.gmra.mxu3 %v1790_v31 }
  0x22   :  { %370 = vmatpush.msrb.mxu3 %v359_v33  ;;  %199 = vmatpush.msra.mxu1 %v64_v34  ;;  %v340_v33 = vld [vmem:[%s3397_s3 + $0xd0] sm:$0xff] }
  0x23   :  { %200 = vmatmul.f32.vlgmr.msra.gmra.mxu1 %v1785_v30  ;;  %1462 = vmatpush.msra.mxu2 %v64_v34  ;;  %v80_v34 = vld [vmem:[%s3395_s2 + $0x88] sm:$0xff] }
  0x24   :  { %371 = vmatpush.msrb.mxu3 %v356_v35  ;;  %227 = vmatmul.f32.vlgmr.msra.gmra.mxu2 %v1790_v31  ;;  %v337_v35 = vld [vmem:[%s3397_s3 + $0xb8] sm:$0xff] }
  0x25   :  { %435 = vmatpush.msrb.mxu0 %v360_v42  ;;  %249 = vmatpush.msrb.mxu2 %v110_v62  ;;  %v38_v42 = vld [vmem:[%s3396_s0 + $0x38] sm:$0xff]  ;;  %v56_v62 = vld [vmem:[%s3398_s1 + $0x48] sm:$0xff] }
  0x26   :  { %372 = vmatpush.msrb.mxu3 %v353_v36  ;;  %500 = vmatpush.msrb.mxu1 %v361_v4  ;;  %v77_v36 = vld [vmem:[%s3395_s2 + $0x70] sm:$0xff] }
  0x27   :  { %436 = vmatpush.msrb.mxu0 %v357_v43  ;;  %250 = vmatpush.msrb.mxu2 %v107_v63  ;;  %v47_v43 = vld [vmem:[%s3398_s1] sm:$0xff] }
  0x28   :  { %373 = vmatpush.msrb.mxu3 %v350_v37  ;;  %501 = vmatpush.msrb.mxu1 %v358_v9  ;;  %v334_v37 = vld [vmem:[%s3397_s3 + $0xa0] sm:$0xff] }
  0x29   :  { %138 = vmatmul.f32.gmra.mxu0 %v1816_v38  ;;  %165 = vmatmul.f32.gmra.mxu3 %v1821_v39 }
  0x2a   :  { %374 = vmatpush.msrb.mxu3 %v347_v40  ;;  %437 = vmatpush.msrb.mxu0 %v354_v45  ;;  %v74_v40 = vld [vmem:[%s3395_s2 + $0x58] sm:$0xff]  ;;  %v328_v45 = vld [vmem:[%s3397_s3 + $0x70] sm:$0xff] }
  0x2b   :  { %203 = vmatmul.f32.gmra.mxu1 %v1816_v38  ;;  %251 = vmatpush.msrb.mxu2 %v104_v2  ;;  %v57_v2 = vld [vmem:[%s3398_s1 + $0x50] sm:$0xff] }
  0x2c   :  { %375 = vmatpush.msrb.mxu3 %v344_v41  ;;  %230 = vmatmul.f32.gmra.mxu2 %v1821_v39  ;;  %v331_v41 = vld [vmem:[%s3397_s3 + $0x88] sm:$0xff] }
  0x2d   :  { %438 = vmatpush.msrb.mxu0 %v351_v50  ;;  %252 = vmatpush.msrb.mxu2 %v101_v8  ;;  %v65_v50 = vld [vmem:[%s3395_s2 + $0x10] sm:$0xff]  ;;  %v58_v8 = vld [vmem:[%s3398_s1 + $0x58] sm:$0xff] }
  0x2e   :  { %376 = vmatpush.msrb.mxu3 %v341_v44  ;;  %502 = vmatpush.msrb.mxu1 %v355_v13  ;;  %v71_v44 = vld [vmem:[%s3395_s2 + $0x40] sm:$0xff] }
  0x2f   :  { %439 = vmatpush.msrb.mxu0 %v348_v52  ;;  %253 = vmatpush.msrb.mxu2 %v98_v11  ;;  %v319_v52 = vld [vmem:[%s3397_s3 + $0x28] sm:$0xff] }
  0x30   :  { %377 = vmatpush.msrb.mxu3 %v338_v46  ;;  %503 = vmatpush.msrb.mxu1 %v352_v19  ;;  %v68_v46 = vld [vmem:[%s3395_s2 + $0x28] sm:$0xff] }
  0x31   :  { %141 = vmatmul.f32.gmra.mxu0 %v1851_v47  ;;  %168 = vmatmul.f32.gmra.mxu3 %v1856_v48 }
  0x32   :  { %378 = vmatpush.msrb.mxu3 %v335_v49  ;;  %440 = vmatpush.msrb.mxu0 %v345_v54  ;;  %v325_v49 = vld [vmem:[%s3397_s3 + $0x58] sm:$0xff]  ;;  %v48_v54 = vld [vmem:[%s3398_s1 + $0x8] sm:$0xff] }
  0x33   :  { %206 = vmatmul.f32.gmra.mxu1 %v1851_v47  ;;  %254 = vmatpush.msrb.mxu2 %v95_v14 }
  0x34   :  { %379 = vmatpush.msrb.mxu3 %v332_v51  ;;  %233 = vmatmul.f32.gmra.mxu2 %v1856_v48  ;;  %v322_v51 = vld [vmem:[%s3397_s3 + $0x40] sm:$0xff] }
  0x35   :  { %441 = vmatpush.msrb.mxu0 %v342_v59  ;;  %255 = vmatpush.msrb.mxu2 %v92_v20  ;;  %v51_v59 = vld [vmem:[%s3398_s1 + $0x20] sm:$0xff] }
  0x36   :  { %380 = vmatpush.msrb.mxu3 %v329_v53  ;;  %504 = vmatpush.msrb.mxu1 %v349_v22  ;;  %v39_v53 = vld [vmem:[%s3396_s0 + $0x40] sm:$0xff] }
  0x37   :  { %442 = vmatpush.msrb.mxu0 %v339_v61  ;;  %256 = vmatpush.msrb.mxu2 %v89_v23 }
  0x38   :  { %381 = vmatpush.msrb.mxu3 %v326_v55  ;;  %505 = vmatpush.msrb.mxu1 %v346_v25  ;;  %v316_v55 = vld [vmem:[%s3397_s3 + $0x10] sm:$0xff]  ;;  %v62_v25 = vld [vmem:[%s3398_s1 + $0x78] sm:$0xff] }
  0x39   :  { %144 = vmatmul.f32.gmra.mxu0 %v1886_v56  ;;  %171 = vmatmul.f32.gmra.mxu3 %v1891_v57 }
  0x3a   :  { %382 = vmatpush.msrb.mxu3 %v323_v58  ;;  %443 = vmatpush.msrb.mxu0 %v336_v1  ;;  %v49_v58 = vld [vmem:[%s3398_s1 + $0x10] sm:$0xff] }
  0x3b   :  { %209 = vmatmul.f32.gmra.mxu1 %v1886_v56  ;;  %257 = vmatpush.msrb.mxu2 %v86_v26 }
  0x3c   :  { %383 = vmatpush.msrb.mxu3 %v320_v60  ;;  %236 = vmatmul.f32.gmra.mxu2 %v1891_v57  ;;  %v55_v60 = vld [vmem:[%s3398_s1 + $0x40] sm:$0xff] }
  0x3d   :  { %444 = vmatpush.msrb.mxu0 %v333_v7  ;;  %506 = vmatpush.msrb.mxu1 %v343_v27 }
  0x3e   :  { %384 = vmatpush.msrb.mxu3 %v317_v0  ;;  %258 = vmatpush.msrb.mxu2 %v83_v32 }
  0x3f   :  { %445 = vmatpush.msrb.mxu0 %v330_v10  ;;  %507 = vmatpush.msrb.mxu1 %v340_v33 }
  0x40   :  { %385 = vmatpush.msrb.mxu3 %v314_v3  ;;  %259 = vmatpush.msrb.mxu2 %v80_v34 }
  0x41   :  { %147 = vmatmul.f32.gmra.mxu0 %v1933_v5  ;;  %174 = vmatmul.f32.gmra.mxu3 %v1938_v6 }
  0x42   :  { %446 = vmatpush.msrb.mxu0 %v327_v12  ;;  %508 = vmatpush.msrb.mxu1 %v337_v35  ;;  %v59_v12 = vld [vmem:[%s3398_s1 + $0x60] sm:$0xff] }
  0x43   :  { %212 = vmatmul.f32.gmra.mxu1 %v1933_v5  ;;  %260 = vmatpush.msrb.mxu2 %v77_v36 }
  0x44   :  { %239 = vmatmul.f32.gmra.mxu2 %v1938_v6  ;;  %447 = vmatpush.msrb.mxu0 %v324_v15 }
  0x45   :  { %509 = vmatpush.msrb.mxu1 %v334_v37  ;;  %261 = vmatpush.msrb.mxu2 %v74_v40 }
  0x46   :  { %448 = vmatpush.msrb.mxu0 %v321_v18 }
  0x47   :  { %510 = vmatpush.msrb.mxu1 %v331_v41  ;;  %262 = vmatpush.msrb.mxu2 %v71_v44 }
  0x48   :  { %449 = vmatpush.msrb.mxu0 %v318_v21  ;;  %v61_v21 = vld [vmem:[%s3398_s1 + $0x70] sm:$0xff] }
  0x49   :  { %150 = vmatmul.f32.gmra.mxu0 %v1974_v16  ;;  %177 = vmatmul.f32.gmra.mxu3 %v1979_v17 }
  0x4a   :  { %450 = vmatpush.msrb.mxu0 %v315_v24  ;;  %511 = vmatpush.msrb.mxu1 %v328_v45 }
  0x4b   :  { %215 = vmatmul.f32.gmra.mxu1 %v1974_v16  ;;  %263 = vmatpush.msrb.mxu2 %v68_v46 }
  0x4c   :  { %242 = vmatmul.f32.gmra.mxu2 %v1979_v17  ;;  %512 = vmatpush.msrb.mxu1 %v325_v49 }
  0x4d   :  { %264 = vmatpush.msrb.mxu2 %v65_v50 }
  0x4e   :  { %513 = vmatpush.msrb.mxu1 %v322_v51 }
  0x50   :  { %514 = vmatpush.msrb.mxu1 %v319_v52 }
  0x51   :  { %153 = vmatmul.f32.gmra.mxu0 %v2018_v28  ;;  %180 = vmatmul.f32.gmra.mxu3 %v2023_v29 }
  0x52   :  { %515 = vmatpush.msrb.mxu1 %v316_v55 }
  0x53   :  { %218 = vmatmul.f32.gmra.mxu1 %v2018_v28 }
  0x54   :  { %245 = vmatmul.f32.gmra.mxu2 %v2023_v29 }
  0x59   :  { %156 = vmatmul.f32.gmra.mxu0 %v38_v42  ;;  %386 = vmatmul.f32.vlgmr.msrb.gmra.mxu3 %v47_v43 }
  0x5b   :  { %221 = vmatmul.f32.gmra.mxu1 %v38_v42 }
  0x5c   :  { %265 = vmatmul.f32.vlgmr.msrb.gmra.mxu2 %v1785_v30  ;;  %v50_v30 = vld [vmem:[%s3398_s1 + $0x18] sm:$0xff] }
  0x61   :  { %159 = vmatmul.f32.gmra.mxu0 %v39_v53  ;;  %389 = vmatmul.f32.gmra.mxu3 %v48_v54 }
  0x63   :  { %224 = vmatmul.f32.gmra.mxu1 %v39_v53 }
  0x64   :  { %268 = vmatmul.f32.gmra.mxu2 %v1816_v38  ;;  %v52_v38 = vld [vmem:[%s3398_s1 + $0x28] sm:$0xff] }
  0x69   :  { %392 = vmatmul.f32.gmra.mxu3 %v49_v58  ;;  %451 = vmatmul.f32.vlgmr.msrb.gmra.mxu0 %v47_v43 }
  0x6b   :  { %516 = vmatmul.f32.vlgmr.msrb.gmra.mxu1 %v47_v43 }
  0x6c   :  { %271 = vmatmul.f32.gmra.mxu2 %v1851_v47  ;;  %v53_v47 = vld [vmem:[%s3398_s1 + $0x30] sm:$0xff] }
  0x71   :  { %395 = vmatmul.f32.gmra.mxu3 %v50_v30  ;;  %454 = vmatmul.f32.gmra.mxu0 %v48_v54 }
  0x73   :  { %519 = vmatmul.f32.gmra.mxu1 %v48_v54 }
  0x74   :  { %274 = vmatmul.f32.gmra.mxu2 %v1886_v56  ;;  %v54_v56 = vld [vmem:[%s3398_s1 + $0x38] sm:$0xff] }
  0x79   :  { %398 = vmatmul.f32.gmra.mxu3 %v51_v59  ;;  %457 = vmatmul.f32.gmra.mxu0 %v49_v58 }
  0x7b   :  { %522 = vmatmul.f32.gmra.mxu1 %v49_v58 }
  0x7c   :  { %277 = vmatmul.f32.gmra.mxu2 %v1933_v5 }
  0x81   :  { %401 = vmatmul.f32.gmra.mxu3 %v52_v38  ;;  %460 = vmatmul.f32.gmra.mxu0 %v50_v30 }
  0x83   :  { %525 = vmatmul.f32.gmra.mxu1 %v50_v30 }
  0x84   :  { %280 = vmatmul.f32.gmra.mxu2 %v1974_v16  ;;  %v60_v16 = vld [vmem:[%s3398_s1 + $0x68] sm:$0xff] }
  0x89   :  { %404 = vmatmul.f32.gmra.mxu3 %v53_v47  ;;  %463 = vmatmul.f32.gmra.mxu0 %v51_v59 }
  0x8b   :  { %528 = vmatmul.f32.gmra.mxu1 %v51_v59 }
  0x8c   :  { %283 = vmatmul.f32.gmra.mxu2 %v2018_v28  ;;  %v2202_v28 = vld [vmem:[%s3399_s4] sm:$0x7] }
  0x8d   :  { %v2213_v33 = vperm.slane %v2202_v28, 0  ;;  %v2232_v46 = vperm.slane %v2202_v28, 1 }
  0x91   :  { %407 = vmatmul.f32.gmra.mxu3 %v54_v56  ;;  %466 = vmatmul.f32.gmra.mxu0 %v52_v38 }
  0x93   :  { %531 = vmatmul.f32.gmra.mxu1 %v52_v38 }
  0x94   :  { %286 = vmatmul.f32.gmra.mxu2 %v38_v42 }
  0x99   :  { %410 = vmatmul.f32.gmra.mxu3 %v55_v60  ;;  %469 = vmatmul.f32.gmra.mxu0 %v53_v47 }
  0x9b   :  { %534 = vmatmul.f32.gmra.mxu1 %v53_v47 }
  0x9c   :  { %289 = vmatmul.f32.gmra.mxu2 %v39_v53 }
  0x9e   :  { %v2118_v61 = vpop.f32.mrf.mxu0 }
  0x9f   :  { %v137_v40 = vadd.f32 %v2118_v61, %v2213_v33 }
  0xa0   :  { %v2123_v63 = vpop.f32.mrf.mxu1 }
  0xa1   :  { %413 = vmatmul.f32.gmra.mxu3 %v56_v62  ;;  %472 = vmatmul.f32.gmra.mxu0 %v54_v56  ;;  %v202_v54 = vadd.f32 %v2123_v63, %v2232_v46 }
  0xa3   :  { %537 = vmatmul.f32.gmra.mxu1 %v54_v56 }
  0xa4   :  { %v2125_v0 = vpop.f32.mrf.mxu3  ;;  %292 = vmatmul.f32.gmra.mxu2 %v1790_v31 }
  0xa6   :  { %v2127_v1 = vpop.f32.mrf.mxu0 }
  0xa7   :  { %v2133_v3 = vpop.f32.mrf.mxu2  ;;  %v140_v51 = vadd.f32 %v2127_v1, %v2213_v33 }
  0xa8   :  { %v2135_v4 = vpop.f32.mrf.mxu1 }
  0xa9   :  { %416 = vmatmul.f32.gmra.mxu3 %v57_v2  ;;  %475 = vmatmul.f32.gmra.mxu0 %v55_v60 }
  0xab   :  { %540 = vmatmul.f32.gmra.mxu1 %v55_v60 }
  0xac   :  { %v2137_v5 = vpop.f32.mrf.mxu3  ;;  %295 = vmatmul.f32.gmra.mxu2 %v1821_v39 }
  0xae   :  { %v2139_v7 = vpop.f32.mrf.mxu0 }
  0xaf   :  { %v2145_v31 = vpop.f32.mrf.mxu2 }
  0xb0   :  { %v2147_v9 = vpop.f32.mrf.mxu1 }
  0xb1   :  { %419 = vmatmul.f32.gmra.mxu3 %v58_v8  ;;  %478 = vmatmul.f32.gmra.mxu0 %v56_v62 }
  0xb3   :  { %543 = vmatmul.f32.gmra.mxu1 %v56_v62  ;;  %v143_v62 = vadd.f32 %v2139_v7, %v2213_v33  ;;  %v2267_v7 = vadd.f32 %v2145_v31, %v2232_v46 }
  0xb4   :  { %v2149_v10 = vpop.f32.mrf.mxu3  ;;  %298 = vmatmul.f32.gmra.mxu2 %v1856_v48 }
  0xb6   :  { %v2151_v11 = vpop.f32.mrf.mxu0 }
  0xb7   :  { %v2157_v39 = vpop.f32.mrf.mxu2 }
  0xb8   :  { %v2159_v13 = vpop.f32.mrf.mxu1 }
  0xb9   :  { %422 = vmatmul.f32.gmra.mxu3 %v59_v12  ;;  %481 = vmatmul.f32.gmra.mxu0 %v57_v2  ;;  %v2284_v31 = vadd.f32 %v2159_v13, %v2232_v46 }
  0xbb   :  { %546 = vmatmul.f32.gmra.mxu1 %v57_v2  ;;  %v2253_v2 = vadd.f32 %v2125_v0, %v2213_v33 }
  0xbc   :  { %v2161_v14 = vpop.f32.mrf.mxu3  ;;  %301 = vmatmul.f32.gmra.mxu2 %v1891_v57 }
  0xbe   :  { %v2163_v15 = vpop.f32.mrf.mxu0 }
  0xbf   :  { %v2169_v48 = vpop.f32.mrf.mxu2 }
  0xc0   :  { %v2171_v18 = vpop.f32.mrf.mxu1 }
  0xc1   :  { %425 = vmatmul.f32.gmra.mxu3 %v60_v16  ;;  %484 = vmatmul.f32.gmra.mxu0 %v58_v8 }
  0xc3   :  { %549 = vmatmul.f32.gmra.mxu1 %v58_v8  ;;  %v205_v8 = vadd.f32 %v2135_v4, %v2232_v46  ;;  %v208_v4 = vadd.f32 %v2147_v9, %v2232_v46  ;;  %v2292_v9 = vadd.f32 %v2163_v15, %v2213_v33 }
  0xc4   :  { %v2173_v19 = vpop.f32.mrf.mxu3  ;;  %304 = vmatmul.f32.gmra.mxu2 %v1938_v6 }
  0xc6   :  { %v2175_v20 = vpop.f32.mrf.mxu0 }
  0xc7   :  { %v2181_v57 = vpop.f32.mrf.mxu2 }
  0xc8   :  { %v2183_v22 = vpop.f32.mrf.mxu1 }
  0xc9   :  { %428 = vmatmul.f32.gmra.mxu3 %v61_v21  ;;  %487 = vmatmul.f32.gmra.mxu0 %v59_v12 }
  0xcb   :  { %552 = vmatmul.f32.gmra.mxu1 %v59_v12  ;;  %v2259_v12 = vadd.f32 %v2133_v3, %v2232_v46  ;;  %v146_v3 = vadd.f32 %v2151_v11, %v2213_v33  ;;  %v2296_v11 = vadd.f32 %v2169_v48, %v2232_v46  ;;  %v2315_v48 = vadd.f32 %v2175_v20, %v2213_v33 }
  0xcc   :  { %v2185_v23 = vpop.f32.mrf.mxu3  ;;  %307 = vmatmul.f32.gmra.mxu2 %v1979_v17  ;;  %v2209_v17 = vld [vmem:[%s3400_s5] sm:$0x7] }
  0xcd   :  { %v2216_v34 = vperm.slane %v2209_v17, 0  ;;  %v2235_v49 = vperm.slane %v2209_v17, 1  ;;  %v2331_v20 = vadd.f32 %v2185_v23, %v2213_v33 }
  0xce   :  { %v2187_v24 = vpop.f32.mrf.mxu0 }
  0xcf   :  { %v2195_v26 = vpop.f32.mrf.mxu2 }
  0xd0   :  { %v2193_v6 = vpop.f32.mrf.mxu1 }
  0xd1   :  { %431 = vmatmul.f32.gmra.mxu3 %v62_v25  ;;  %490 = vmatmul.f32.gmra.mxu0 %v60_v16 }
  0xd3   :  { %555 = vmatmul.f32.gmra.mxu1 %v60_v16 }
  0xd4   :  { %v2197_v27 = vpop.f32.mrf.mxu3  ;;  %310 = vmatmul.f32.gmra.mxu2 %v2023_v29 }
  0xd6   :  { %v2204_v32 = vpop.f32.mrf.mxu0 }
  0xd7   :  { %v2220_v36 = vpop.f32.mrf.mxu2 }
  0xd8   :  { %v2218_v35 = vpop.f32.mrf.mxu1 }
  0xd9   :  { %493 = vmatmul.f32.gmra.mxu0 %v61_v21 }
  0xdb   :  { %558 = vmatmul.f32.gmra.mxu1 %v61_v21  ;;  %v2263_v21 = vadd.f32 %v2137_v5, %v2213_v33  ;;  %v2280_v5 = vadd.f32 %v2157_v39, %v2232_v46 }
  0xdc   :  { %v387_v37 = vpop.f32.mrf.mxu3 }
  0xdd   :  { %v388_v41 = vadd.f32 %v387_v37, %v2216_v34  ;;  %v2272_v37 = vadd.f32 %v2149_v10, %v2213_v33 }
  0xde   :  { %v2225_v42 = vpop.f32.mrf.mxu0 }
  0xdf   :  { %v565_v29 = vadd.f32 %v388_v41, %v137_v40  ;;  %v2229_v45 = vpop.f32.mrf.mxu2 }
  0xe0   :  { %v2227_v44 = vpop.f32.mrf.mxu1 }
  0xe1   :  { %v1389_v43 = vmul.f32 -1.442695, %v565_v29  ;;  %496 = vmatmul.f32.gmra.mxu0 %v62_v25 }
  0xe3   :  { %1465 = vpow2.f32 %v1389_v43  ;;  %561 = vmatmul.f32.gmra.mxu1 %v62_v25  ;;  %v2288_v43 = vadd.f32 %v2161_v14, %v2213_v33  ;;  %v2310_v14 = vadd.f32 %v2171_v18, %v2232_v46  ;;  %v2326_v18 = vadd.f32 %v2181_v57, %v2232_v46 }
  0xe4   :  { %v390_v50 = vpop.f32.mrf.mxu3 }
  0xe5   :  { %v391_v52 = vadd.f32 %v390_v50, %v2216_v34 }
  0xe6   :  { %v452_v53 = vpop.f32.mrf.mxu0 }
  0xe7   :  { %v566_v55 = vadd.f32 %v391_v52, %v140_v51  ;;  %v453_v58 = vadd.f32 %v452_v53, %v2235_v49  ;;  %v2245_v60 = vpop.f32.mrf.mxu2  ;;  %v2306_v51 = vadd.f32 %v2173_v19, %v2213_v33  ;;  %v2319_v53 = vperm.slane %v2209_v17, 2 }
  0xe8   :  { %v517_v56 = vpop.f32.mrf.mxu1  ;;  %v2322_v19 = vperm.slane %v2202_v28, 2 }
  0xe9   :  { %v1466_v30 = vpop.eup %1465  ;;  %v1390_v59 = vmul.f32 -1.442695, %v566_v55  ;;  %v885_v38 = vadd.f32 %v453_v58, %v202_v54  ;;  %v518_v23 = vadd.f32 %v517_v56, %v2319_v53 }
  0xea   :  { %v2243_v47 = vadd.f32 1.0, %v1466_v30  ;;  %v2335_v30 = vadd.f32 %v2183_v22, %v2232_v46  ;;  %v267_v22 = vadd.f32 %v2229_v45, %v2322_v19 }
  0xeb   :  { %1467 = vpow2.f32 %v1390_v59  ;;  %v1405_v1 = vmul.f32 -1.442695, %v885_v38 }
  0xec   :  { %1469 = vrcp.f32 %v2243_v47  ;;  %v393_v61 = vpop.f32.mrf.mxu3  ;;  %v654_v28 = vand.u32 2147483647, %v2243_v47  ;;  %v656_v59 = vand.u32 2147483648, %v2243_v47  ;;  %vm650_vm1 = vweird.f32 %v2243_v47 }
  0xed   :  { %v394_v63 = vadd.f32 %v393_v61, %v2216_v34  ;;  %1471 = vpow2.f32 %v1405_v1  ;;  %v2342_v1 = vadd.f32 %v2187_v24, %v2213_v33 }
  0xee   :  { %v455_v16 = vpop.f32.mrf.mxu0  ;;  %vm655_vm3 = vcmp.eq.f32.partialorder %v654_v28, 8.507059e+37  ;;  %v657_v24 = vor.u32 1.1754944e-38, %v656_v59 }
  0xef   :  { %v567_v25 = vadd.f32 %v394_v63, %v143_v62  ;;  %v456_v0 = vadd.f32 %v455_v16, %v2235_v49  ;;  %v2302_v50 = vpop.f32.mrf.mxu2 }
  0xf0   :  { %v2300_v13 = vpop.f32.mrf.mxu1 }
  0xf1   :  { %v1468_v40 = vpop.eup %1467  ;;  %v1391_v41 = vmul.f32 -1.442695, %v567_v25  ;;  %v886_v29 = vadd.f32 %v456_v0, %v205_v8 }
  0xf2   :  { %v1470_v10 = vpop.eup %1469  ;;  %v2298_v39 = vadd.f32 1.0, %v1468_v40 }
  0xf3   :  { %1473 = vpow2.f32 %v1391_v41  ;;  %v646_v15 = vmul.f32 %v1470_v10, %v2243_v47  ;;  %v1406_v54 = vmul.f32 -1.442695, %v886_v29  ;;  %v1472_v38 = vpop.eup %1471  ;;  %vm651_vm0 = vweird.f32 %v1470_v10 }
  0xf4   :  { %1475 = vrcp.f32 %v2298_v39  ;;  %v396_v52 = vpop.f32.mrf.mxu3  ;;  %vm652_vm2 = vmor %vm650_vm1, %vm651_vm0  ;;  %v2362_v29 = vadd.f32 %v2193_v6, %v2232_v46  ;;  %v2376_v6 = vadd.f32 %v2204_v32, %v2213_v33  ;;  %v2390_v32 = vadd.f32 %v2220_v36, %v2232_v46 }
  0xf5   :  { %v397_v55 = vadd.f32 %v396_v52, %v2216_v34  ;;  %v647_v58 = vsub.f32 1.0, %v646_v15  ;;  %1477 = vpow2.f32 %v1406_v54  ;;  %v2366_v15 = vadd.f32 %v2195_v26, %v2232_v46 }
  0xf6   :  { %v458_v17 = vpop.f32.mrf.mxu0  ;;  %v2381_v26 = vadd.f32 %v2218_v35, %v2232_v46  ;;  %v669_v35 = vand.u32 2147483647, %v2298_v39  ;;  %vm665_vm5 = vweird.f32 %v2298_v39 }
  0xf7   :  { %v568_v57 = vadd.f32 %v397_v55, %v146_v3  ;;  %v459_v61 = vadd.f32 %v458_v17, %v2235_v49  ;;  %v648_v62 = vmul.f32 %v1470_v10, %v647_v58  ;;  %v2350_v3 = vadd.f32 1.0, %v1472_v38  ;;  %v2356_v47 = vpop.f32.mrf.mxu2 }
  0xf8   :  { %v2354_v56 = vpop.f32.mrf.mxu1  ;;  %v2371_v55 = vadd.f32 %v2197_v27, %v2213_v33  ;;  %vm670_vm7 = vcmp.eq.f32.partialorder %v669_v35, 8.507059e+37 }
  0xf9   :  { %v1474_v63 = vpop.eup %1473  ;;  %v1392_v8 = vmul.f32 -1.442695, %v568_v57  ;;  %v887_v16 = vadd.f32 %v459_v61, %v208_v4  ;;  %v649_v25 = vadd.f32 %v1470_v10, %v648_v62  ;;  %3424 = vst [vmem:[#allocation2_spill] sm:$0xff] %v2350_v3  ;;  %v671_v61 = vand.u32 2147483648, %v2298_v39 }
  0xfa   :  { %v2348_v0 = vpop.eup %1475  ;;  %v2352_v40 = vadd.f32 1.0, %v1474_v63 }
  0xfb   :  { %1479 = vpow2.f32 %v1392_v8  ;;  %v1407_v45 = vmul.f32 -1.442695, %v887_v16  ;;  %v653_v41 = vsel %vm652_vm2, %v1470_v10, %v649_v25  ;;  %v661_v4 = vmul.f32 %v2348_v0, %v2298_v39  ;;  %v1478_v59 = vpop.eup %1477 }
  0xfc   :  { %1481 = vrcp.f32 %v2352_v40  ;;  %v658_v52 = vsel %vm655_vm3, %v657_v24, %v653_v41  ;;  %v399_v54 = vpop.f32.mrf.mxu3  ;;  %vm666_vm4 = vweird.f32 %v2348_v0  ;;  %v521_v8 = vadd.f32 %v2300_v13, %v2319_v53 }
  0xfd   :  { %1483 = vpow2.f32 %v1407_v45  ;;  %v1205_v10 = vmul.f32 %v658_v52, %v518_v23  ;;  %v400_v58 = vadd.f32 %v399_v54, %v2216_v34  ;;  %v662_v28 = vsub.f32 1.0, %v661_v4  ;;  %vm667_vm6 = vmor %vm665_vm5, %vm666_vm4 }
  0xfe   :  { %1485 = vrcp.f32 %v2350_v3  ;;  %v461_v17 = vpop.f32.mrf.mxu0  ;;  %v2404_v36 = vadd.f32 1.0, %v1478_v59  ;;  %v672_v13 = vor.u32 1.1754944e-38, %v671_v61  ;;  %v270_v52 = vadd.f32 %v2245_v60, %v2322_v19 }
  0xff   :  { %v2383_v38 = vadd.f32 %v1205_v10, %v267_v22  ;;  %v569_v27 = vadd.f32 %v400_v58, %v2292_v9  ;;  %v462_v57 = vadd.f32 %v461_v17, %v2235_v49  ;;  %v663_v62 = vmul.f32 %v2348_v0, %v662_v28 }
 0x100   :  { %v2397_v22 = vadd.f32 %v2225_v42, %v2213_v33  ;;  %3425 = vst [vmem:[#allocation3_spill] sm:$0xff] %v2404_v36  ;;  %v2410_v45 = vpop.f32.mrf.mxu1  ;;  %v2412_v33 = vpop.f32.mrf.mxu2  ;;  %v2426_v10 = vadd.f32 %v2227_v44, %v2232_v46  ;;  %v686_v46 = vand.u32 2147483648, %v2352_v40  ;;  %v684_v35 = vand.u32 2147483647, %v2352_v40 }
 0x101   :  { %v1480_v23 = vpop.eup %1479  ;;  %v1393_v9 = vmul.f32 -1.442695, %v569_v27  ;;  %v888_v63 = vadd.f32 %v462_v57, %v2284_v31  ;;  %v664_v24 = vadd.f32 %v2348_v0, %v663_v62  ;;  %vm680_vm9 = vweird.f32 %v2352_v40 }
 0x102   :  { %v2402_v16 = vpop.eup %1481  ;;  %v2406_v25 = vadd.f32 1.0, %v1480_v23  ;;  %vm685_vm11 = vcmp.eq.f32.partialorder %v684_v35, 8.507059e+37 }
 0x103   :  { %v1484_v42 = vpop.eup %1483  ;;  %1487 = vpow2.f32 %v1393_v9  ;;  %v1408_v31 = vmul.f32 -1.442695, %v888_v63  ;;  %v676_v41 = vmul.f32 %v2402_v16, %v2352_v40  ;;  %v668_v39 = vsel %vm667_vm6, %v2348_v0, %v664_v24 }
 0x104   :  { %v2418_v4 = vpop.eup %1485  ;;  %1489 = vrcp.f32 %v2406_v25  ;;  %v402_v54 = vpop.f32.mrf.mxu3  ;;  %v673_v58 = vsel %vm670_vm7, %v672_v13, %v668_v39  ;;  %v2430_v28 = vadd.f32 1.0, %v1484_v42  ;;  %vm681_vm8 = vweird.f32 %v2402_v16 }
 0x105   :  { %3426 = vst [vmem:[#allocation4_spill] sm:$0xff] %v2418_v4  ;;  %1491 = vpow2.f32 %v1408_v31  ;;  %v403_v17 = vadd.f32 %v402_v54, %v2216_v34  ;;  %v1206_v59 = vmul.f32 %v673_v58, %v521_v8  ;;  %v677_v0 = vsub.f32 1.0, %v676_v41  ;;  %vm682_vm10 = vmor %vm680_vm9, %vm681_vm8 }
 0x106   :  { %1493 = vrcp.f32 %v2404_v36  ;;  %3427 = vst [vmem:[#allocation5_spill] sm:$0xff] %v2430_v28  ;;  %v464_v27 = vpop.f32.mrf.mxu0  ;;  %v2434_v57 = vmul.f32 %v2418_v4, %v2350_v3  ;;  %v524_v8 = vadd.f32 %v2354_v56, %v2319_v53  ;;  %vm695_vm13 = vweird.f32 %v2406_v25 }
 0x107   :  { %v570_v60 = vadd.f32 %v403_v17, %v2315_v48  ;;  %v465_v44 = vadd.f32 %v464_v27, %v2235_v49  ;;  %v1222_v61 = vadd.f32 %v1206_v59, %v270_v52  ;;  %v678_v62 = vmul.f32 %v2402_v16, %v677_v0 }
 0x108   :  { %3428 = vst [vmem:[#allocation6_spill] sm:$0xff] %v2434_v57  ;;  %v273_v48 = vadd.f32 %v2302_v50, %v2322_v19  ;;  %1495 = vrcp.f32 %v2430_v28  ;;  %v2454_v13 = vpop.f32.mrf.mxu1  ;;  %v2456_v41 = vpop.f32.mrf.mxu2  ;;  %v687_v50 = vor.u32 1.1754944e-38, %v686_v46  ;;  %v276_v27 = vadd.f32 %v2356_v47, %v2322_v19 }
 0x109   :  { %v1488_v23 = vpop.eup %1487  ;;  %v1394_v9 = vmul.f32 -1.442695, %v570_v60  ;;  %v889_v63 = vadd.f32 %v465_v44, %v2310_v14  ;;  %v679_v31 = vadd.f32 %v2402_v16, %v678_v62 }
 0x10a   :  { %v2447_v24 = vpop.eup %1489  ;;  %v2450_v42 = vadd.f32 1.0, %v1488_v23  ;;  %v701_v23 = vand.u32 2147483648, %v2406_v25 }
 0x10b   :  { %v1492_v14 = vpop.eup %1491  ;;  %1497 = vpow2.f32 %v1394_v9  ;;  %v1409_v56 = vmul.f32 -1.442695, %v889_v63  ;;  %v691_v39 = vmul.f32 %v2447_v24, %v2406_v25  ;;  %v683_v40 = vsel %vm682_vm10, %v2402_v16, %v679_v31 }
 0x10c   :  { %v2462_v52 = vpop.eup %1493  ;;  %1499 = vrcp.f32 %v2450_v42  ;;  %v405_v58 = vpop.f32.mrf.mxu3  ;;  %v688_v17 = vsel %vm685_vm11, %v687_v50, %v683_v40  ;;  %v2471_v0 = vadd.f32 1.0, %v1492_v14  ;;  %vm696_vm12 = vweird.f32 %v2447_v24 }
 0x10d   :  { %3429 = vst [vmem:[#allocation7_spill] sm:$0xff] %v2462_v52  ;;  %1501 = vpow2.f32 %v1409_v56  ;;  %v406_v59 = vadd.f32 %v405_v58, %v2216_v34  ;;  %v1207_v60 = vmul.f32 %v688_v17, %v524_v8  ;;  %v692_v46 = vsub.f32 1.0, %v691_v39  ;;  %vm697_vm14 = vmor %vm695_vm13, %vm696_vm12 }
 0x10e   :  { %1503 = vtanh.f32 %v2383_v38  ;;  %3430 = vst [vmem:[#allocation8_spill] sm:$0xff] %v2471_v0  ;;  %v467_v44 = vpop.f32.mrf.mxu0  ;;  %v2475_v62 = vmul.f32 %v2462_v52, %v2404_v36  ;;  %v2480_v9 = vpop.eup %1495  ;;  %v699_v63 = vand.u32 2147483647, %v2406_v25  ;;  %vm710_vm1 = vweird.f32 %v2450_v42 }
 0x10f   :  { %v571_v16 = vadd.f32 %v406_v59, %v2342_v1  ;;  %v468_v35 = vadd.f32 %v467_v44, %v2235_v49  ;;  %3432 = vst [vmem:[#allocation10_spill] sm:$0xff] %v2480_v9  ;;  %v1223_v47 = vadd.f32 %v1207_v60, %v273_v48  ;;  %v693_v38 = vmul.f32 %v2447_v24, %v692_v46 }
 0x110   :  { %3431 = vst [vmem:[#allocation9_spill] sm:$0xff] %v2475_v62  ;;  %1505 = vtanh.f32 %v1222_v61  ;;  %v527_v1 = vadd.f32 %v2410_v45, %v2319_v53  ;;  %v2495_v39 = vpop.f32.mrf.mxu1  ;;  %v2497_v40 = vpop.f32.mrf.mxu2  ;;  %v702_v45 = vor.u32 1.1754944e-38, %v701_v23  ;;  %vm700_vm15 = vcmp.eq.f32.partialorder %v699_v63, 8.507059e+37 }
 0x111   :  { %v1498_v8 = vpop.eup %1497  ;;  %v1395_v31 = vmul.f32 -1.442695, %v571_v16  ;;  %v890_v14 = vadd.f32 %v468_v35, %v2335_v30  ;;  %1507 = vrcp.f32 %v2471_v0  ;;  %v694_v48 = vadd.f32 %v2447_v24, %v693_v38 }
 0x112   :  { %v2488_v56 = vpop.eup %1499  ;;  %v2491_v50 = vadd.f32 1.0, %v1498_v8  ;;  %v279_v16 = vadd.f32 %v2412_v33, %v2322_v19  ;;  %v2513_v35 = vmul.f32 %v2480_v9, %v2430_v28  ;;  %v716_v33 = vand.u32 2147483648, %v2450_v42 }
 0x113   :  { %v1502_v61 = vpop.eup %1501  ;;  %1509 = vpow2.f32 %v1395_v31  ;;  %v1410_v30 = vmul.f32 -1.442695, %v890_v14  ;;  %v706_v58 = vmul.f32 %v2488_v56, %v2450_v42  ;;  %v698_v25 = vsel %vm697_vm14, %v2447_v24, %v694_v48 }
 0x114   :  { %v2503_v17 = vpop.eup %1503  ;;  %1511 = vrcp.f32 %v2491_v50  ;;  %v408_v60 = vpop.f32.mrf.mxu3  ;;  %v703_v44 = vsel %vm700_vm15, %v702_v45, %v698_v25  ;;  %v2515_v23 = vadd.f32 1.0, %v1502_v61  ;;  %v530_v48 = vadd.f32 %v2454_v13, %v2319_v53 }
 0x115   :  { %3433 = vst [vmem:[#allocation11_spill] sm:$0xff] %v2503_v17  ;;  %1513 = vpow2.f32 %v1410_v30  ;;  %v409_v46 = vadd.f32 %v408_v60, %v2216_v34  ;;  %v1208_v38 = vmul.f32 %v703_v44, %v527_v1  ;;  %v707_v31 = vsub.f32 1.0, %v706_v58 }
 0x116   :  { %v470_v8 = vpop.f32.mrf.mxu0  ;;  %v2517_v14 = vpop.eup %1505  ;;  %vm711_vm0 = vweird.f32 %v2488_v56  ;;  %v714_v1 = vand.u32 2147483647, %v2450_v42  ;;  %1515 = vtanh.f32 %v1223_v47  ;;  %v533_v13 = vadd.f32 %v2495_v39, %v2319_v53 }
 0x117   :  { %3434 = vst [vmem:[#allocation12_spill] sm:$0xff] %v2517_v14  ;;  %v572_v24 = vadd.f32 %v409_v46, %v2376_v6  ;;  %v471_v63 = vadd.f32 %v470_v8, %v2235_v49  ;;  %v2524_v30 = vpop.eup %1507  ;;  %v1224_v45 = vadd.f32 %v1208_v38, %v276_v27  ;;  %v708_v61 = vmul.f32 %v2488_v56, %v707_v31  ;;  %vm712_vm2 = vmor %vm710_vm1, %vm711_vm0 }
 0x118   :  { %3435 = vst [vmem:[#allocation13_spill] sm:$0xff] %v2524_v30  ;;  %1517 = vrcp.f32 %v2515_v23  ;;  %v535_v46 = vpop.f32.mrf.mxu1  ;;  %v2538_v38 = vpop.f32.mrf.mxu2  ;;  %vm715_vm3 = vcmp.eq.f32.partialorder %v714_v1, 8.507059e+37  ;;  %vm725_vm4 = vweird.f32 %v2491_v50 }
 0x119   :  { %v1510_v58 = vpop.eup %1509  ;;  %v1396_v25 = vmul.f32 -1.442695, %v572_v24  ;;  %v891_v6 = vadd.f32 %v471_v63, %v2362_v29  ;;  %v709_v44 = vadd.f32 %v2488_v56, %v708_v61  ;;  %v717_v29 = vor.u32 1.1754944e-38, %v716_v33 }
 0x11a   :  { %v2531_v60 = vpop.eup %1511  ;;  %v2535_v27 = vadd.f32 1.0, %v1510_v58  ;;  %v282_v63 = vadd.f32 %v2456_v41, %v2322_v19  ;;  %v2550_v61 = vmul.f32 %v2524_v30, %v2471_v0 }
 0x11b   :  { %v1514_v8 = vpop.eup %1513  ;;  %1519 = vpow2.f32 %v1396_v25  ;;  %v1411_v47 = vmul.f32 -1.442695, %v891_v6  ;;  %v721_v42 = vmul.f32 %v2531_v60, %v2491_v50  ;;  %v713_v31 = vsel %vm712_vm2, %v2488_v56, %v709_v44 }
 0x11c   :  { %1521 = vrcp.f32 %v2535_v27  ;;  %v411_v24 = vpop.f32.mrf.mxu3  ;;  %3436 = vst [vmem:[#allocation14_spill] sm:$0xff] %v2550_v61  ;;  %v718_v58 = vsel %vm715_vm3, %v717_v29, %v713_v31  ;;  %v2553_v25 = vadd.f32 1.0, %v1514_v8  ;;  %v731_v56 = vand.u32 2147483648, %v2491_v50  ;;  %v2556_v1 = vpop.eup %1515 }
 0x11d   :  { %1523 = vpow2.f32 %v1411_v47  ;;  %v412_v33 = vadd.f32 %v411_v24, %v2216_v34  ;;  %v1209_v6 = vmul.f32 %v718_v58, %v530_v48  ;;  %v722_v54 = vsub.f32 1.0, %v721_v42  ;;  %3437 = vst [vmem:[#allocation15_spill] sm:$0xff] %v2556_v1 }
 0x11e   :  { %v473_v59 = vpop.f32.mrf.mxu0  ;;  %v2563_v47 = vpop.eup %1517  ;;  %vm726_vm5 = vweird.f32 %v2531_v60  ;;  %v729_v29 = vand.u32 2147483647, %v2491_v50  ;;  %1525 = vtanh.f32 %v1224_v45  ;;  %v746_v36 = vand.u32 2147483648, %v2535_v27 }
 0x11f   :  { %v573_v44 = vadd.f32 %v412_v33, %v2397_v22  ;;  %v474_v41 = vadd.f32 %v473_v59, %v2235_v49  ;;  %v1225_v8 = vadd.f32 %v1209_v6, %v279_v16  ;;  %v723_v48 = vmul.f32 %v2531_v60, %v722_v54  ;;  %vm727_vm6 = vmor %vm725_vm4, %vm726_vm5 }
 0x120   :  { %1527 = vrcp.f32 %v2553_v25  ;;  %v732_v54 = vor.u32 1.1754944e-38, %v731_v56  ;;  %v538_v58 = vpop.f32.mrf.mxu1  ;;  %v2576_v33 = vpop.f32.mrf.mxu2  ;;  %v2580_v31 = vmul.f32 %v2563_v47, %v2515_v23  ;;  %vm730_vm7 = vcmp.eq.f32.partialorder %v729_v29, 8.507059e+37 }
 0x121   :  { %v1520_v42 = vpop.eup %1519  ;;  %v1397_v22 = vmul.f32 -1.442695, %v573_v44  ;;  %v892_v59 = vadd.f32 %v474_v41, %v2381_v26  ;;  %v724_v16 = vadd.f32 %v2531_v60, %v723_v48  ;;  %v285_v41 = vadd.f32 %v2497_v40, %v2322_v19 }
 0x122   :  { %v2570_v24 = vpop.eup %1521  ;;  %v2573_v39 = vadd.f32 1.0, %v1520_v42  ;;  %vm740_vm8 = vweird.f32 %v2535_v27 }
 0x123   :  { %v1524_v6 = vpop.eup %1523  ;;  %1529 = vpow2.f32 %v1397_v22  ;;  %v1412_v45 = vmul.f32 -1.442695, %v892_v59  ;;  %v736_v26 = vmul.f32 %v2570_v24, %v2535_v27  ;;  %v728_v56 = vsel %vm727_vm6, %v2531_v60, %v724_v16 }
 0x124   :  { %1531 = vrcp.f32 %v2573_v39  ;;  %v414_v44 = vpop.f32.mrf.mxu3  ;;  %v733_v48 = vsel %vm730_vm7, %v732_v54, %v728_v56  ;;  %v536_v22 = vadd.f32 %v535_v46, %v2319_v53  ;;  %v2594_v50 = vadd.f32 1.0, %v1524_v6  ;;  %v2597_v1 = vpop.eup %1525 }
 0x125   :  { %1533 = vpow2.f32 %v1412_v45  ;;  %v415_v42 = vadd.f32 %v414_v44, %v2216_v34  ;;  %v1210_v59 = vmul.f32 %v733_v48, %v533_v13  ;;  %v737_v17 = vsub.f32 1.0, %v736_v26  ;;  %3438 = vst [vmem:[#allocation16_spill] sm:$0xff] %v2597_v1 }
 0x126   :  { %v476_v14 = vpop.f32.mrf.mxu0  ;;  %v2603_v16 = vpop.eup %1527  ;;  %vm741_vm9 = vweird.f32 %v2570_v24  ;;  %v744_v13 = vand.u32 2147483647, %v2535_v27  ;;  %1535 = vtanh.f32 %v1225_v8  ;;  %v747_v56 = vor.u32 1.1754944e-38, %v746_v36 }
 0x127   :  { %v574_v29 = vadd.f32 %v415_v42, %v2253_v2  ;;  %v477_v40 = vadd.f32 %v476_v14, %v2235_v49  ;;  %v1226_v46 = vadd.f32 %v1210_v59, %v282_v63  ;;  %v738_v54 = vmul.f32 %v2570_v24, %v737_v17  ;;  %vm742_vm10 = vmor %vm740_vm8, %vm741_vm9 }
 0x128   :  { %v2611_v2 = vadd.f32 %v2538_v38, %v2322_v19  ;;  %1537 = vrcp.f32 %v2594_v50  ;;  %v541_v44 = vpop.f32.mrf.mxu1  ;;  %v2619_v48 = vpop.f32.mrf.mxu2  ;;  %vm745_vm11 = vcmp.eq.f32.partialorder %v744_v13, 8.507059e+37  ;;  %v761_v1 = vand.u32 2147483648, %v2573_v39 }
 0x129   :  { %v1530_v6 = vpop.eup %1529  ;;  %v1398_v45 = vmul.f32 -1.442695, %v574_v29  ;;  %v893_v26 = vadd.f32 %v477_v40, %v2426_v10  ;;  %v739_v17 = vadd.f32 %v2570_v24, %v738_v54  ;;  %v2623_v10 = vmul.f32 %v2603_v16, %v2553_v25 }
 0x12a   :  { %v2613_v14 = vpop.eup %1531  ;;  %v2616_v63 = vadd.f32 1.0, %v1530_v6  ;;  %v759_v29 = vand.u32 2147483647, %v2573_v39  ;;  %vm755_vm12 = vweird.f32 %v2573_v39 }
 0x12b   :  { %v1534_v8 = vpop.eup %1533  ;;  %1539 = vpow2.f32 %v1398_v45  ;;  %v1413_v38 = vmul.f32 -1.442695, %v893_v26  ;;  %v751_v42 = vmul.f32 %v2613_v14, %v2573_v39  ;;  %v743_v36 = vsel %vm742_vm10, %v2570_v24, %v739_v17 }
 0x12c   :  { %1541 = vrcp.f32 %v2616_v63  ;;  %v417_v59 = vpop.f32.mrf.mxu3  ;;  %v2634_v40 = vadd.f32 1.0, %v1534_v8  ;;  %v748_v54 = vsel %vm745_vm11, %v747_v56, %v743_v36  ;;  %v539_v26 = vadd.f32 %v538_v58, %v2319_v53  ;;  %v2639_v52 = vpop.eup %1535 }
 0x12d   :  { %1543 = vpow2.f32 %v1413_v38  ;;  %v418_v6 = vadd.f32 %v417_v59, %v2216_v34  ;;  %v1211_v45 = vmul.f32 %v748_v54, %v536_v22  ;;  %v752_v60 = vsub.f32 1.0, %v751_v42  ;;  %3439 = vst [vmem:[#allocation17_spill] sm:$0xff] %v2639_v52 }
 0x12e   :  { %v479_v27 = vpop.f32.mrf.mxu0  ;;  %v2645_v56 = vpop.eup %1537  ;;  %vm756_vm13 = vweird.f32 %v2613_v14  ;;  %v2651_v58 = vadd.f32 %v2576_v33, %v2322_v19  ;;  %1545 = vrcp.f32 %v2634_v40  ;;  %vm2655_vm14 = vcmp.eq.f32.partialorder %v759_v29, 8.507059e+37 }
 0x12f   :  { %v575_v13 = vadd.f32 %v418_v6, %v2263_v21  ;;  %v480_v17 = vadd.f32 %v479_v27, %v2235_v49  ;;  %v1227_v8 = vadd.f32 %v1211_v45, %v285_v41  ;;  %v753_v22 = vmul.f32 %v2613_v14, %v752_v60  ;;  %vm757_vm15 = vmor %vm755_vm12, %vm756_vm13 }
 0x130   :  { %1547 = vtanh.f32 %v1226_v46  ;;  %v762_v54 = vor.u32 1.1754944e-38, %v761_v1  ;;  %v544_v33 = vpop.f32.mrf.mxu1  ;;  %v2664_v6 = vpop.f32.mrf.mxu2  ;;  %v2668_v27 = vmul.f32 %v2645_v56, %v2594_v50  ;;  %vm770_vm0 = vweird.f32 %v2616_v63 }
 0x131   :  { %v1540_v38 = vpop.eup %1539  ;;  %v1399_v42 = vmul.f32 -1.442695, %v575_v13  ;;  %v894_v21 = vadd.f32 %v480_v17, %v2259_v12  ;;  %v754_v60 = vadd.f32 %v2613_v14, %v753_v22  ;;  %v542_v13 = vadd.f32 %v541_v44, %v2319_v53 }
 0x132   :  { %v2659_v59 = vpop.eup %1541  ;;  %v2661_v41 = vadd.f32 1.0, %v1540_v38  ;;  %v774_v17 = vand.u32 2147483647, %v2616_v63  ;;  %v2694_v36 = vadd.f32 %v2619_v48, %v2322_v19 }
 0x133   :  { %v1544_v45 = vpop.eup %1543  ;;  %1549 = vpow2.f32 %v1399_v42  ;;  %v1414_v12 = vmul.f32 -1.442695, %v894_v21  ;;  %v766_v46 = vmul.f32 %v2659_v59, %v2616_v63  ;;  %v758_v1 = vsel %vm757_vm15, %v2613_v14, %v754_v60 }
 0x134   :  { %1551 = vrcp.f32 %v2661_v41  ;;  %v420_v29 = vpop.f32.mrf.mxu3  ;;  %v2680_v22 = vadd.f32 1.0, %v1544_v45  ;;  %v763_v38 = vsel %vm2655_vm14, %v762_v54, %v758_v1  ;;  %v776_v14 = vand.u32 2147483648, %v2616_v63  ;;  %v2687_v60 = vpop.eup %1545 }
 0x135   :  { %1553 = vpow2.f32 %v1414_v12  ;;  %v421_v39 = vadd.f32 %v420_v29, %v2216_v34  ;;  %v1212_v42 = vmul.f32 %v763_v38, %v539_v26  ;;  %v767_v24 = vsub.f32 1.0, %v766_v46 }
 0x136   :  { %v482_v21 = vpop.f32.mrf.mxu0  ;;  %v2696_v54 = vpop.eup %1547  ;;  %1555 = vtanh.f32 %v1227_v8  ;;  %vm771_vm1 = vweird.f32 %v2659_v59  ;;  %vm2703_vm2 = vcmp.eq.f32.partialorder %v774_v17, 8.507059e+37  ;;  %v2711_v8 = vmul.f32 %v2687_v60, %v2634_v40 }
 0x137   :  { %v576_v45 = vadd.f32 %v421_v39, %v2272_v37  ;;  %v483_v12 = vadd.f32 %v482_v21, %v2235_v49  ;;  %3442 = vst [vmem:[#allocation18_spill] sm:$0xff] %v2696_v54  ;;  %v1228_v26 = vadd.f32 %v1212_v42, %v2611_v2  ;;  %v768_v46 = vmul.f32 %v2659_v59, %v767_v24  ;;  %vm772_vm3 = vmor %vm770_vm0, %vm771_vm1 }
 0x138   :  { %1557 = vrcp.f32 %v2680_v22  ;;  %v777_v39 = vor.u32 1.1754944e-38, %v776_v14  ;;  %v547_v42 = vpop.f32.mrf.mxu1  ;;  %v2716_v21 = vpop.f32.mrf.mxu2  ;;  %v791_v44 = vand.u32 2147483648, %v2661_v41  ;;  %vm785_vm4 = vweird.f32 %v2661_v41 }
 0x139   :  { %v1550_v1 = vpop.eup %1549  ;;  %v1400_v29 = vmul.f32 -1.442695, %v576_v45  ;;  %v895_v37 = vadd.f32 %v483_v12, %v2267_v7  ;;  %v769_v24 = vadd.f32 %v2659_v59, %v768_v46  ;;  %v789_v12 = vand.u32 2147483647, %v2661_v41 }
 0x13a   :  { %v2707_v48 = vpop.eup %1551  ;;  %v2713_v2 = vadd.f32 1.0, %v1550_v1 }
 0x13b   :  { %v1554_v45 = vpop.eup %1553  ;;  %1559 = vpow2.f32 %v1400_v29  ;;  %v1415_v7 = vmul.f32 -1.442695, %v895_v37  ;;  %v781_v17 = vmul.f32 %v2707_v48, %v2661_v41  ;;  %v773_v14 = vsel %vm772_vm3, %v2659_v59, %v769_v24 }
 0x13c   :  { %1561 = vrcp.f32 %v2713_v2  ;;  %v2726_v46 = vadd.f32 1.0, %v1554_v45  ;;  %v423_v1 = vpop.f32.mrf.mxu3  ;;  %v545_v29 = vadd.f32 %v544_v33, %v2319_v53  ;;  %v778_v37 = vsel %vm2703_vm2, %v777_v39, %v773_v14  ;;  %v2734_v62 = vpop.eup %1555 }
 0x13d   :  { %1563 = vpow2.f32 %v1415_v7  ;;  %v424_v63 = vadd.f32 %v423_v1, %v2216_v34  ;;  %v1213_v4 = vmul.f32 %v778_v37, %v542_v13  ;;  %v782_v57 = vsub.f32 1.0, %v781_v17 }
 0x13e   :  { %v485_v45 = vpop.f32.mrf.mxu0  ;;  %v2738_v59 = vpop.eup %1557  ;;  %vm2742_vm5 = vcmp.eq.f32.partialorder %v789_v12, 8.507059e+37  ;;  %v2748_v39 = vadd.f32 %v2664_v6, %v2322_v19  ;;  %1565 = vrcp.f32 %v2726_v46  ;;  %vm786_vm6 = vweird.f32 %v2707_v48 }
 0x13f   :  { %v577_v33 = vadd.f32 %v424_v63, %v2288_v43  ;;  %v486_v38 = vadd.f32 %v485_v45, %v2235_v49  ;;  %v1229_v13 = vadd.f32 %v1213_v4, %v2651_v58  ;;  %v783_v7 = vmul.f32 %v2707_v48, %v782_v57  ;;  %vm787_vm7 = vmor %vm785_vm4, %vm786_vm6 }
 0x140   :  { %1567 = vtanh.f32 %v1228_v26  ;;  %v792_v14 = vor.u32 1.1754944e-38, %v791_v44  ;;  %v2759_v6 = vmul.f32 %v2738_v59, %v2680_v22  ;;  %v2765_v57 = vadd.f32 %v547_v42, %v2319_v53  ;;  %v550_v58 = vpop.f32.mrf.mxu1  ;;  %v2767_v63 = vpop.f32.mrf.mxu2 }
 0x141   :  { %v1560_v17 = vpop.eup %1559  ;;  %v1401_v43 = vmul.f32 -1.442695, %v577_v33  ;;  %v896_v12 = vadd.f32 %v486_v38, %v2280_v5  ;;  %v784_v4 = vadd.f32 %v2707_v48, %v783_v7  ;;  %v804_v45 = vand.u32 2147483647, %v2713_v2 }
 0x142   :  { %v2755_v1 = vpop.eup %1561  ;;  %v2761_v37 = vadd.f32 1.0, %v1560_v17  ;;  %v806_v7 = vand.u32 2147483648, %v2713_v2  ;;  %vm800_vm8 = vweird.f32 %v2713_v2 }
 0x143   :  { %v1564_v26 = vpop.eup %1563  ;;  %1569 = vpow2.f32 %v1401_v43  ;;  %v1416_v5 = vmul.f32 -1.442695, %v896_v12  ;;  %v796_v44 = vmul.f32 %v2755_v1, %v2713_v2  ;;  %v788_v33 = vsel %vm787_vm7, %v2707_v48, %v784_v4 }
 0x144   :  { %1571 = vrcp.f32 %v2761_v37  ;;  %v2777_v42 = vadd.f32 1.0, %v1564_v26  ;;  %v426_v38 = vpop.f32.mrf.mxu3  ;;  %v793_v17 = vsel %vm2742_vm5, %v792_v14, %v788_v33  ;;  %v2785_v43 = vpop.eup %1565  ;;  %v2791_v48 = vadd.f32 %v2716_v21, %v2322_v19 }
 0x145   :  { %1573 = vpow2.f32 %v1416_v5  ;;  %v427_v41 = vadd.f32 %v426_v38, %v2216_v34  ;;  %v797_v3 = vsub.f32 1.0, %v796_v44  ;;  %v1214_v24 = vmul.f32 %v793_v17, %v545_v29 }
 0x146   :  { %1575 = vrcp.f32 %v2777_v42  ;;  %v488_v26 = vpop.f32.mrf.mxu0  ;;  %v2793_v4 = vpop.eup %1567  ;;  %vm2797_vm9 = vcmp.eq.f32.partialorder %v804_v45, 8.507059e+37  ;;  %vm801_vm10 = vweird.f32 %v2755_v1  ;;  %v807_v44 = vor.u32 1.1754944e-38, %v806_v7 }
 0x147   :  { %v578_v14 = vadd.f32 %v427_v41, %v2306_v51  ;;  %v489_v5 = vadd.f32 %v488_v26, %v2235_v49  ;;  %1577 = vtanh.f32 %v1229_v13  ;;  %v798_v38 = vmul.f32 %v2755_v1, %v797_v3  ;;  %vm802_vm12 = vmor %vm800_vm8, %vm801_vm10 }
 0x148   :  { %v2805_v21 = vmul.f32 %v2785_v43, %v2726_v46  ;;  %v2809_v17 = vadd.f32 %v550_v58, %v2319_v53  ;;  %vm815_vm11 = vweird.f32 %v2761_v37  ;;  %v819_v13 = vand.u32 2147483647, %v2761_v37  ;;  %v553_v7 = vpop.f32.mrf.mxu1  ;;  %v305_v58 = vpop.f32.mrf.mxu2 }
 0x149   :  { %v1570_v12 = vpop.eup %1569  ;;  %v1402_v29 = vmul.f32 -1.442695, %v578_v14  ;;  %v897_v51 = vadd.f32 %v489_v5, %v2296_v11  ;;  %v799_v3 = vadd.f32 %v2755_v1, %v798_v38  ;;  %v1230_v54 = vadd.f32 %v1214_v24, %v2694_v36 }
 0x14a   :  { %v2811_v45 = vpop.eup %1571  ;;  %v2813_v41 = vadd.f32 1.0, %v1570_v12  ;;  %v821_v24 = vand.u32 2147483648, %v2761_v37  ;;  %vm2844_vm13 = vcmp.eq.f32.partialorder %v819_v13, 8.507059e+37  ;;  %v2850_v33 = vadd.f32 %v2767_v63, %v2322_v19 }
 0x14b   :  { %v1574_v26 = vpop.eup %1573  ;;  %1579 = vpow2.f32 %v1402_v29  ;;  %v1417_v14 = vmul.f32 -1.442695, %v897_v51  ;;  %v811_v11 = vmul.f32 %v2811_v45, %v2761_v37  ;;  %v803_v38 = vsel %vm802_vm12, %v2755_v1, %v799_v3 }
 0x14c   :  { %v2825_v12 = vpop.eup %1575  ;;  %1581 = vrcp.f32 %v2813_v41  ;;  %v2828_v5 = vadd.f32 1.0, %v1574_v26  ;;  %v429_v36 = vpop.f32.mrf.mxu3  ;;  %v808_v2 = vsel %vm2797_vm9, %v807_v44, %v803_v38  ;;  %vm816_vm14 = vweird.f32 %v2811_v45 }
 0x14d   :  { %v1116_v29 = vmul.f32 %v2825_v12, %v2777_v42  ;;  %1583 = vpow2.f32 %v1417_v14  ;;  %v430_v51 = vadd.f32 %v429_v36, %v2216_v34  ;;  %v2837_v0 = vpop.eup %1577  ;;  %v1215_v1 = vmul.f32 %v808_v2, %v2765_v57  ;;  %vm817_vm0 = vmor %vm815_vm11, %vm816_vm14 }
 0x14e   :  { %1585 = vrcp.f32 %v2828_v5  ;;  %v491_v3 = vpop.f32.mrf.mxu0  ;;  %v812_v26 = vsub.f32 1.0, %v811_v11  ;;  %v822_v57 = vor.u32 1.1754944e-38, %v821_v24  ;;  %v2856_v13 = vadd.f32 %v553_v7, %v2319_v53 }
 0x14f   :  { %v579_v61 = vadd.f32 %v430_v51, %v2331_v20  ;;  %v492_v52 = vadd.f32 %v491_v3, %v2235_v49  ;;  %1587 = vtanh.f32 %v1230_v54  ;;  %v1117_v11 = vsub.f32 1.0, %v1116_v29 }
 0x150   :  { %v813_v44 = vmul.f32 %v2811_v45, %v812_v26  ;;  %v1231_v63 = vadd.f32 %v1215_v1, %v2748_v39  ;;  %vm830_vm15 = vweird.f32 %v2813_v41  ;;  %v834_v24 = vand.u32 2147483647, %v2813_v41  ;;  %v556_v3 = vpop.f32.mrf.mxu1 }
 0x151   :  { %v1580_v38 = vpop.eup %1579  ;;  %v1403_v36 = vmul.f32 -1.442695, %v579_v61  ;;  %v898_v20 = vadd.f32 %v492_v52, %v2326_v18  ;;  %v836_v52 = vand.u32 2147483648, %v2813_v41 }
 0x152   :  { %v2858_v2 = vpop.eup %1581  ;;  %v2860_v51 = vadd.f32 1.0, %v1580_v38  ;;  %v814_v54 = vadd.f32 %v2811_v45, %v813_v44  ;;  %v2880_v44 = vadd.f32 %v305_v58, %v2322_v19  ;;  %vm2893_vm1 = vcmp.eq.f32.partialorder %v834_v24, 8.507059e+37 }
 0x153   :  { %v1584_v29 = vpop.eup %1583  ;;  %1589 = vpow2.f32 %v1403_v36  ;;  %v1418_v61 = vmul.f32 -1.442695, %v898_v20  ;;  %v826_v18 = vmul.f32 %v2858_v2, %v2813_v41  ;;  %v308_v20 = vpop.f32.mrf.mxu2  ;;  %vm831_vm2 = vweird.f32 %v2858_v2 }
 0x154   :  { %v2873_v39 = vpop.eup %1585  ;;  %1591 = vrcp.f32 %v2860_v51  ;;  %v2876_v7 = vadd.f32 1.0, %v1584_v29  ;;  %v818_v1 = vsel %vm817_vm0, %v2811_v45, %v814_v54  ;;  %v432_v26 = vpop.f32.mrf.mxu3  ;;  %vm845_vm3 = vweird.f32 %v2860_v51  ;;  %vm832_vm4 = vmor %vm830_vm15, %vm831_vm2 }
 0x155   :  { %v2884_v37 = vmul.f32 %v2873_v39, %v2828_v5  ;;  %1593 = vpow2.f32 %v1418_v61  ;;  %v823_v38 = vsel %vm2844_vm13, %v822_v57, %v818_v1  ;;  %v433_v36 = vadd.f32 %v432_v26, %v2216_v34  ;;  %v2889_v30 = vpop.eup %1587 }
 0x156   :  { %1595 = vrcp.f32 %v2876_v7  ;;  %v1216_v45 = vmul.f32 %v823_v38, %v2809_v17  ;;  %v494_v54 = vpop.f32.mrf.mxu0  ;;  %v827_v58 = vsub.f32 1.0, %v826_v18  ;;  %v2900_v34 = vmul.f32 %v2825_v12, %v1117_v11 }
 0x157   :  { %1597 = vtanh.f32 %v1231_v63  ;;  %v580_v61 = vadd.f32 %v433_v36, %v2371_v55  ;;  %v495_v14 = vadd.f32 %v494_v54, %v2235_v49  ;;  %v837_v1 = vor.u32 1.1754944e-38, %v836_v52 }
 0x158   :  { %v828_v57 = vmul.f32 %v2858_v2, %v827_v58  ;;  %v2905_v17 = vadd.f32 %v556_v3, %v2319_v53  ;;  %v1232_v11 = vadd.f32 %v1216_v45, %v2791_v48  ;;  %v849_v52 = vand.u32 2147483647, %v2860_v51 }
 0x159   :  { %v1590_v24 = vpop.eup %1589  ;;  %v1404_v26 = vmul.f32 -1.442695, %v580_v61  ;;  %v899_v63 = vadd.f32 %v495_v14, %v2366_v15  ;;  %v851_v58 = vand.u32 2147483648, %v2860_v51  ;;  %v559_v61 = vpop.f32.mrf.mxu1  ;;  %vm1150_vm7 = vweird.f32 %v2876_v7 }
 0x15a   :  { %v1592_v55 = vpop.eup %1591  ;;  %v2910_v38 = vadd.f32 1.0, %v1590_v24  ;;  %v829_v36 = vadd.f32 %v2858_v2, %v828_v57  ;;  %v2928_v57 = vadd.f32 %v308_v20, %v2322_v19  ;;  %vm2938_vm6 = vcmp.eq.f32.partialorder %v849_v52, 8.507059e+37 }
 0x15b   :  { %v1594_v54 = vpop.eup %1593  ;;  %1599 = vpow2.f32 %v1404_v26  ;;  %v1419_v3 = vmul.f32 -1.442695, %v899_v63  ;;  %v841_v15 = vmul.f32 %v1592_v55, %v2860_v51  ;;  %vm846_vm5 = vweird.f32 %v1592_v55  ;;  %v311_v29 = vpop.f32.mrf.mxu2 }
 0x15c   :  { %v2921_v14 = vpop.eup %1595  ;;  %1601 = vrcp.f32 %v2910_v38  ;;  %v2924_v48 = vadd.f32 1.0, %v1594_v54  ;;  %v833_v45 = vsel %vm832_vm4, %v2858_v2, %v829_v36  ;;  %v864_v28 = vand.u32 2147483647, %v2910_v38  ;;  %vm847_vm9 = vmor %vm845_vm3, %vm846_vm5 }
 0x15d   :  { %v2930_v24 = vpop.eup %1597  ;;  %v1146_v41 = vmul.f32 %v2921_v14, %v2876_v7  ;;  %1603 = vpow2.f32 %v1419_v3  ;;  %v838_v26 = vsel %vm2893_vm1, %v837_v1, %v833_v45  ;;  %v842_v63 = vsub.f32 1.0, %v841_v15 }
 0x15e   :  { %1605 = vrcp.f32 %v2924_v48  ;;  %v1217_v54 = vmul.f32 %v838_v26, %v2856_v13  ;;  %v497_v18 = vpop.f32.mrf.mxu0  ;;  %v866_v3 = vand.u32 2147483648, %v2910_v38  ;;  %v852_v15 = vor.u32 1.1754944e-38, %v851_v58 }
 0x15f   :  { %v498_v20 = vadd.f32 %v497_v18, %v2235_v49  ;;  %v843_v36 = vmul.f32 %v1592_v55, %v842_v63  ;;  %v1147_v1 = vsub.f32 1.0, %v1146_v41  ;;  %1607 = vtanh.f32 %v1232_v11 }
 0x160   :  { %v560_v26 = vadd.f32 %v559_v61, %v2319_v53  ;;  %vm860_vm8 = vweird.f32 %v2910_v38  ;;  %v1233_v63 = vadd.f32 %v1217_v54, %v2850_v33  ;;  %v2956_v11 = vadd.f32 %v311_v29, %v2322_v19 }
 0x161   :  { %v1600_v13 = vpop.eup %1599  ;;  %v900_v45 = vadd.f32 %v498_v20, %v2390_v32  ;;  %v844_v52 = vadd.f32 %v1592_v55, %v843_v36  ;;  %vm1151_vm10 = vweird.f32 %v2921_v14  ;;  %vm2960_vm11 = vcmp.eq.f32.partialorder %v864_v28, 8.507059e+37 }
 0x162   :  { %v1602_v49 = vpop.eup %1601  ;;  %v2949_v18 = vadd.f32 1.0, %v1600_v13  ;;  %v867_v36 = vor.u32 1.1754944e-38, %v866_v3  ;;  %v1148_v54 = vmul.f32 %v2921_v14, %v1147_v1  ;;  %v562_v13 = vpop.f32.mrf.mxu1  ;;  %v1156_v2 = vand.u32 2147483648, %v2876_v7  ;;  %vm2994_vm14 = vmor %vm1150_vm7, %vm1151_vm10 }
 0x163   :  { %v1604_v32 = vpop.eup %1603  ;;  %v1420_v58 = vmul.f32 -1.442695, %v900_v45  ;;  %v848_v41 = vsel %vm847_vm9, %v1592_v55, %v844_v52  ;;  %v856_v61 = vmul.f32 %v1602_v49, %v2910_v38  ;;  %v1154_v52 = vand.u32 2147483647, %v2876_v7 }
 0x164   :  { %v2964_v33 = vpop.eup %1605  ;;  %1609 = vrcp.f32 %v2949_v18  ;;  %v2967_v51 = vadd.f32 1.0, %v1604_v32  ;;  %v853_v19 = vsel %vm2938_vm6, %v852_v15, %v848_v41  ;;  %vm861_vm12 = vweird.f32 %v1602_v49 }
 0x165   :  { %v1161_v55 = vmul.f32 %v2964_v33, %v2924_v48  ;;  %1611 = vpow2.f32 %v1420_v58  ;;  %v1218_v28 = vmul.f32 %v853_v19, %v2905_v17  ;;  %v857_v29 = vsub.f32 1.0, %v856_v61  ;;  %v2975_v3 = vpop.eup %1607  ;;  %vm862_vm15 = vmor %vm860_vm8, %vm861_vm12 }
 0x166   :  { %1613 = vrcp.f32 %v2967_v51  ;;  %v1186_v45 = vand.u32 2147483648, %v2967_v51  ;;  %v2983_v17 = vadd.f32 %v562_v13, %v2319_v53  ;;  %v879_v58 = vand.u32 2147483647, %v2949_v18 }
 0x167   :  { %v1162_v15 = vsub.f32 1.0, %v1161_v55  ;;  %v1234_v1 = vadd.f32 %v1218_v28, %v2880_v44  ;;  %v858_v32 = vmul.f32 %v1602_v49, %v857_v29  ;;  %1615 = vtanh.f32 %v1233_v63 }
 0x168   :  { %v881_v41 = vand.u32 2147483648, %v2949_v18  ;;  %v1184_v19 = vand.u32 2147483647, %v2967_v51  ;;  %vm875_vm13 = vweird.f32 %v2949_v18  ;;  %v1149_v9 = vadd.f32 %v2921_v14, %v1148_v54 }
 0x169   :  { %v859_v61 = vadd.f32 %v1602_v49, %v858_v32  ;;  %1617 = vtanh.f32 %v1234_v1  ;;  %v3000_v63 = vor.u32 1.1754944e-38, %v1186_v45  ;;  %vm3002_vm0 = vcmp.eq.f32.partialorder %v1154_v52, 8.507059e+37 }
 0x16a   :  { %v1610_v53 = vpop.eup %1609  ;;  %v1163_v54 = vmul.f32 %v2964_v33, %v1162_v15  ;;  %vm1180_vm1 = vweird.f32 %v2967_v51  ;;  %vm3009_vm2 = vcmp.eq.f32.partialorder %v879_v58, 8.507059e+37  ;;  %v1153_v38 = vsel %vm2994_vm14, %v2921_v14, %v1149_v9 }
 0x16b   :  { %v1612_v28 = vpop.eup %1611  ;;  %v863_v7 = vsel %vm862_vm15, %v1602_v49, %v859_v61  ;;  %v871_v29 = vmul.f32 %v1610_v53, %v2949_v18  ;;  %v1157_v45 = vor.u32 1.1754944e-38, %v1156_v2  ;;  %vm876_vm3 = vweird.f32 %v1610_v53 }
 0x16c   :  { %v1614_v52 = vpop.eup %1613  ;;  %v3016_v1 = vadd.f32 1.0, %v1612_v28  ;;  %v868_v15 = vsel %vm2960_vm11, %v867_v36, %v863_v7  ;;  %v882_v32 = vor.u32 1.1754944e-38, %v881_v41  ;;  %vm1120_vm4 = vweird.f32 %v2777_v42  ;;  %vm877_vm11 = vmor %vm875_vm13, %vm876_vm3 }
 0x16d   :  { %v1176_v49 = vmul.f32 %v1614_v52, %v2967_v51  ;;  %v1219_v58 = vmul.f32 %v868_v15, %v560_v26  ;;  %vm3022_vm5 = vcmp.eq.f32.partialorder %v1184_v19, 8.507059e+37  ;;  %v872_v44 = vsub.f32 1.0, %v871_v29  ;;  %v1616_v14 = vpop.eup %1615 }
 0x16e   :  { %v1158_v9 = vsel %vm3002_vm0, %v1157_v45, %v1153_v38  ;;  %1619 = vrcp.f32 %v3016_v1  ;;  %v1201_v20 = vand.u32 2147483648, %v3016_v1  ;;  %vm1181_vm6 = vweird.f32 %v1614_v52 }
 0x16f   :  { %v1164_v36 = vadd.f32 %v2964_v33, %v1163_v54  ;;  %v1177_v2 = vsub.f32 1.0, %v1176_v49  ;;  %v1235_v41 = vadd.f32 %v1219_v58, %v2928_v57  ;;  %v873_v26 = vmul.f32 %v1610_v53, %v872_v44  ;;  %v1618_v28 = vpop.eup %1617  ;;  %v1625_v58 = vld [vmem:[%s3398_s1 + $0x60] sm:$0xff]  ;;  %vm1182_vm13 = vmor %vm1180_vm1, %vm1181_vm6  ;;  %v1626_v54 = vld [vmem:[%s3398_s1 + $0x70] sm:$0xff] }
 0x170   :  { %v1199_v19 = vand.u32 2147483647, %v3016_v1  ;;  %v3033_v7 = vor.u32 1.1754944e-38, %v1201_v20  ;;  %vm1165_vm7 = vweird.f32 %v2924_v48  ;;  %vm1166_vm8 = vweird.f32 %v2964_v33 }
 0x171   :  { %v1169_v55 = vand.u32 2147483647, %v2924_v48  ;;  %v1178_v29 = vmul.f32 %v1614_v52, %v1177_v2  ;;  %1621 = vtanh.f32 %v1235_v41  ;;  %v874_v38 = vadd.f32 %v1610_v53, %v873_v26  ;;  %vm3038_vm9 = vmor %vm1165_vm7, %vm1166_vm8 }
 0x172   :  { %v1171_v57 = vand.u32 2147483648, %v2924_v48  ;;  %vm1195_vm10 = vweird.f32 %v3016_v1  ;;  %v1168_v45 = vsel %vm3038_vm9, %v2964_v33, %v1164_v36  ;;  %v1265_v49 = vsub.f32 1.0, %v1158_v9 }
 0x173   :  { %vm3050_vm12 = vcmp.eq.f32.partialorder %v1169_v55, 8.507059e+37  ;;  %v1297_v48 = vmul.f32 %v1625_v58, %v1158_v9  ;;  %v1179_v44 = vadd.f32 %v1614_v52, %v1178_v29  ;;  %v878_v20 = vsel %vm877_vm11, %v1610_v53, %v874_v38 }
 0x174   :  { %v1172_v2 = vor.u32 1.1754944e-38, %v1171_v57  ;;  %v1119_v18 = vadd.f32 %v2825_v12, %v2900_v34  ;;  %v1620_v41 = vpop.eup %1619  ;;  %v883_v33 = vsel %vm3009_vm2, %v882_v32, %v878_v20  ;;  %v1281_v36 = vmul.f32 %v1616_v14, %v1265_v49  ;;  %v1627_v57 = vld [vmem:[%s3398_s1 + $0x68] sm:$0xff] }
 0x175   :  { %vm1121_vm14 = vweird.f32 %v2825_v12  ;;  %v1124_v26 = vand.u32 2147483647, %v2777_v42  ;;  %v1191_v9 = vmul.f32 %v1620_v41, %v3016_v1  ;;  %v1183_v53 = vsel %vm1182_vm13, %v1614_v52, %v1179_v44 }
 0x176   :  { %v1220_v55 = vmul.f32 %v883_v33, %v2983_v17  ;;  %vm1196_vm15 = vweird.f32 %v1620_v41  ;;  %vm3068_vm0 = vcmp.eq.f32.partialorder %v1199_v19, 8.507059e+37  ;;  %vm3074_vm1 = vmor %vm1120_vm4, %vm1121_vm14  ;;  %v1188_v13 = vsel %vm3022_vm5, %v3000_v63, %v1183_v53 }
 0x177   :  { %v1173_v52 = vsel %vm3050_vm12, %v1172_v2, %v1168_v45  ;;  %v3083_v32 = vadd.f32 %v1297_v48, %v1281_v36  ;;  %v1123_v17 = vsel %vm3074_vm1, %v2825_v12, %v1119_v18  ;;  %v1622_v14 = vpop.eup %1621  ;;  %v1192_v19 = vsub.f32 1.0, %v1191_v9  ;;  %vm1197_vm5 = vmor %vm1195_vm10, %vm1196_vm15 }
 0x178   :  { %v1267_v29 = vsub.f32 1.0, %v1188_v13  ;;  %v1236_v38 = vadd.f32 %v1220_v55, %v2956_v11  ;;  %v1299_v61 = vmul.f32 %v1626_v54, %v1188_v13  ;;  %v1266_v63 = vsub.f32 1.0, %v1173_v52 }
 0x179   :  { %v1298_v45 = vmul.f32 %v1627_v57, %v1173_v52  ;;  %1329 = vst [vmem:[%s3401_s8 + $0x60] sm:$0xff] %v3083_v32  ;;  %vm3099_vm2 = vcmp.eq.f32.partialorder %v1124_v26, 8.507059e+37  ;;  %v1126_v11 = vand.u32 2147483648, %v2777_v42  ;;  %v1193_v15 = vmul.f32 %v1620_v41, %v1192_v19 }
 0x17a   :  { %v1283_v49 = vmul.f32 %v1622_v14, %v1267_v29  ;;  %1623 = vtanh.f32 %v1236_v38  ;;  %v3475_v58 = vsub.f32 1.0, %v2884_v37  ;;  %v1282_v44 = vmul.f32 %v1618_v28, %v1266_v63  ;;  %v1630_v63 = vld [vmem:[%s3398_s1 + $0x58] sm:$0xff] }
 0x17b   :  { %v1127_v20 = vor.u32 1.1754944e-38, %v1126_v11  ;;  %vm1135_vm3 = vweird.f32 %v2828_v5  ;;  %vm1136_vm4 = vweird.f32 %v2873_v39  ;;  %v1194_v2 = vadd.f32 %v1620_v41, %v1193_v15 }
 0x17c   :  { %v1133_v48 = vmul.f32 %v2873_v39, %v3475_v58  ;;  %v1315_v18 = vadd.f32 %v1299_v61, %v1283_v49  ;;  %v1139_v33 = vand.u32 2147483647, %v2828_v5  ;;  %v3114_v36 = vadd.f32 %v1298_v45, %v1282_v44  ;;  %vm3118_vm6 = vmor %vm1135_vm3, %vm1136_vm4 }
 0x17d   :  { %v1128_v37 = vsel %vm3099_vm2, %v1127_v20, %v1123_v17  ;;  %v1141_v26 = vand.u32 2147483648, %v2828_v5  ;;  %v3478_v9 = vsub.f32 1.0, %v2759_v6  ;;  %v1198_v53 = vsel %vm1197_vm5, %v1620_v41, %v1194_v2  ;;  %v1628_v41 = vld [vmem:[%s3398_s1 + $0x50] sm:$0xff] }
 0x17e   :  { %v1134_v42 = vadd.f32 %v2873_v39, %v1133_v48  ;;  %1331 = vst [vmem:[%s3401_s8 + $0x70] sm:$0xff] %v1315_v18  ;;  %vm1140_vm7 = vcmp.eq.f32.partialorder %v1139_v33, 8.507059e+37  ;;  %v1263_v51 = vsub.f32 1.0, %v1128_v37  ;;  %v1203_v13 = vsel %vm3068_vm0, %v3033_v7, %v1198_v53  ;;  %v1629_v7 = vld [vmem:[%s3398_s1 + $0x78] sm:$0xff] }
 0x17f   :  { %v1088_v1 = vmul.f32 %v2738_v59, %v3478_v9  ;;  %1330 = vst [vmem:[%s3401_s8 + $0x68] sm:$0xff] %v3114_v36  ;;  %v1341_v6 = vpack.c.bf16 %v3114_v36, %v3083_v32  ;;  %v1142_v5 = vor.u32 1.1754944e-38, %v1141_v26  ;;  %v1268_v17 = vsub.f32 1.0, %v1203_v13 }
 0x180   :  { %v1138_v55 = vsel %vm3118_vm6, %v2873_v39, %v1134_v42  ;;  %v1295_v39 = vmul.f32 %v1628_v41, %v1128_v37  ;;  %v1624_v52 = vpop.eup %1623  ;;  %v1300_v34 = vmul.f32 %v1629_v7, %v1203_v13  ;;  %v1279_v14 = vmul.f32 %v2930_v24, %v1263_v51 }
 0x181   :  { %v1089_v19 = vadd.f32 %v2738_v59, %v1088_v1  ;;  %v1143_v29 = vsel %vm1140_vm7, %v1142_v5, %v1138_v55  ;;  %vm1090_vm8 = vweird.f32 %v2680_v22  ;;  %vm1091_vm9 = vweird.f32 %v2738_v59  ;;  %v1632_v5 = vld [vmem:[%s3398_s1 + $0x48] sm:$0xff] }
 0x182   :  { %v1094_v38 = vand.u32 2147483647, %v2680_v22  ;;  %v1284_v54 = vmul.f32 %v1624_v52, %v1268_v17  ;;  %v1264_v61 = vsub.f32 1.0, %v1143_v29  ;;  %v1296_v57 = vmul.f32 %v1630_v63, %v1143_v29  ;;  %vm3157_vm10 = vmor %vm1090_vm8, %vm1091_vm9 }
 0x183   :  { %v3155_v45 = vadd.f32 %v1295_v39, %v1279_v14  ;;  %v1093_v12 = vsel %vm3157_vm10, %v2738_v59, %v1089_v19  ;;  %v1096_v15 = vand.u32 2147483648, %v2680_v22  ;;  %v3483_v49 = vsub.f32 1.0, %v2805_v21 }
 0x184   :  { %vm3164_vm11 = vcmp.eq.f32.partialorder %v1094_v38, 8.507059e+37  ;;  %v1316_v48 = vadd.f32 %v1300_v34, %v1284_v54  ;;  %v1280_v44 = vmul.f32 %v2975_v3, %v1264_v61  ;;  %vm1105_vm12 = vweird.f32 %v2726_v46  ;;  %v1633_v38 = vld [vmem:[%s3398_s1 + $0x30] sm:$0xff] }
 0x185   :  { %v1103_v58 = vmul.f32 %v2785_v43, %v3483_v49  ;;  %1327 = vst [vmem:[%s3401_s8 + $0x50] sm:$0xff] %v3155_v45  ;;  %vm1106_vm13 = vweird.f32 %v2785_v43  ;;  %v1097_v59 = vor.u32 1.1754944e-38, %v1096_v15  ;;  %v1109_v22 = vand.u32 2147483647, %v2726_v46 }
 0x186   :  { %v1111_v21 = vand.u32 2147483648, %v2726_v46  ;;  %1332 = vst [vmem:[%s3401_s8 + $0x78] sm:$0xff] %v1316_v48  ;;  %v1342_v3 = vpack.c.bf16 %v1316_v48, %v1315_v18  ;;  %v1312_v2 = vadd.f32 %v1296_v57, %v1280_v44  ;;  %vm1107_vm14 = vmor %vm1105_vm12, %vm1106_vm13  ;;  %v3484_v42 = vsub.f32 1.0, %v2668_v27  ;;  %v1631_v27 = vld [vmem:[%s3398_s1 + $0x40] sm:$0xff] }
 0x187   :  { %v1104_v20 = vadd.f32 %v2785_v43, %v1103_v58  ;;  %vm1060_vm15 = vweird.f32 %v2594_v50  ;;  %v1098_v37 = vsel %vm3164_vm11, %v1097_v59, %v1093_v12  ;;  %vm1110_vm0 = vcmp.eq.f32.partialorder %v1109_v22, 8.507059e+37  ;;  %v1638_v59 = vld [vmem:[%s3398_s1 + $0x18] sm:$0xff] }
 0x188   :  { %v1058_v33 = vmul.f32 %v2645_v56, %v3484_v42  ;;  %v1112_v46 = vor.u32 1.1754944e-38, %v1111_v21  ;;  %1349 = vmatpush.bf16.msra.mxu2 %v1342_v3  ;;  %1328 = vst [vmem:[%s3401_s8 + $0x58] sm:$0xff] %v1312_v2  ;;  %v1340_v18 = vpack.c.bf16 %v1312_v2, %v3155_v45  ;;  %v1261_v26 = vsub.f32 1.0, %v1098_v37  ;;  %v3495_v21 = vld [vmem:[#allocation10_spill] sm:$0xff]  ;;  %v3496_v42 = vld [vmem:[#allocation5_spill] sm:$0xff] }
 0x189   :  { %v1108_v28 = vsel %vm1107_vm14, %v2785_v43, %v1104_v20  ;;  %v1293_v9 = vmul.f32 %v1631_v27, %v1098_v37  ;;  %vm1061_vm1 = vweird.f32 %v2645_v56  ;;  %v1064_v43 = vand.u32 2147483647, %v2594_v50 }
 0x18a   :  { %v1059_v1 = vadd.f32 %v2645_v56, %v1058_v33  ;;  %v1113_v53 = vsel %vm1110_vm0, %v1112_v46, %v1108_v28  ;;  %v1066_v55 = vand.u32 2147483648, %v2594_v50  ;;  %v1277_v13 = vmul.f32 %v2837_v0, %v1261_v26  ;;  %vm1062_vm2 = vmor %vm1060_vm15, %vm1061_vm1 }
 0x18b   :  { %v1262_v51 = vsub.f32 1.0, %v1113_v53  ;;  %v1294_v41 = vmul.f32 %v1632_v5, %v1113_v53  ;;  %v3485_v39 = vsub.f32 1.0, %v2711_v8  ;;  %vm1065_vm3 = vcmp.eq.f32.partialorder %v1064_v43, 8.507059e+37  ;;  %v3500_v43 = vld [vmem:[#allocation14_spill] sm:$0xff] }
 0x18c   :  { %v1063_v17 = vsel %vm1062_vm2, %v2645_v56, %v1059_v1  ;;  %v1067_v7 = vor.u32 1.1754944e-38, %v1066_v55  ;;  %vm1075_vm4 = vweird.f32 %v2634_v40  ;;  %1350 = vmatpush.bf16.msra.mxu2 %v1341_v6  ;;  %v1309_v34 = vadd.f32 %v1293_v9, %v1277_v13  ;;  %v3497_v9 = vld [vmem:[#allocation17_spill] sm:$0xff] }
 0x18d   :  { %v1073_v52 = vmul.f32 %v2687_v60, %v3485_v39  ;;  %v1278_v0 = vmul.f32 %v2889_v30, %v1262_v51  ;;  %vm1076_vm5 = vweird.f32 %v2687_v60  ;;  %v1079_v56 = vand.u32 2147483647, %v2634_v40  ;;  %v3502_v51 = vld [vmem:[#allocation13_spill] sm:$0xff] }
 0x18e   :  { %v1068_v8 = vsel %vm1065_vm3, %v1067_v7, %v1063_v17  ;;  %vm3220_vm6 = vmor %vm1075_vm4, %vm1076_vm5  ;;  %v1081_v19 = vand.u32 2147483648, %v2634_v40  ;;  %v3488_v29 = vsub.f32 1.0, %v2580_v31  ;;  %1325 = vst [vmem:[%s3401_s8 + $0x40] sm:$0xff] %v1309_v34  ;;  %vm1030_vm8 = vweird.f32 %v2515_v23 }
 0x18f   :  { %v1074_v50 = vadd.f32 %v2687_v60, %v1073_v52  ;;  %v1310_v36 = vadd.f32 %v1294_v41, %v1278_v0  ;;  %v1259_v6 = vsub.f32 1.0, %v1068_v8  ;;  %v1291_v54 = vmul.f32 %v1633_v38, %v1068_v8  ;;  %v1636_v41 = vld [vmem:[%s3398_s1 + $0x28] sm:$0xff]  ;;  %v3510_v38 = vld [vmem:[#allocation2_spill] sm:$0xff] }
 0x190   :  { %v1028_v32 = vmul.f32 %v2563_v47, %v3488_v29  ;;  %vm1080_vm7 = vcmp.eq.f32.partialorder %v1079_v56, 8.507059e+37  ;;  %v1082_v40 = vor.u32 1.1754944e-38, %v1081_v19  ;;  %1351 = vmatpush.bf16.msra.mxu2 %v1340_v18  ;;  %vm1031_vm9 = vweird.f32 %v2563_v47 }
 0x191   :  { %v1078_v30 = vsel %vm3220_vm6, %v2687_v60, %v1074_v50  ;;  %1326 = vst [vmem:[%s3401_s8 + $0x48] sm:$0xff] %v1310_v36  ;;  %v1339_v61 = vpack.c.bf16 %v1310_v36, %v1309_v34  ;;  %v1275_v60 = vmul.f32 %v2734_v62, %v1259_v6  ;;  %v1034_v63 = vand.u32 2147483647, %v2515_v23  ;;  %vm3246_vm10 = vmor %vm1030_vm8, %vm1031_vm9  ;;  %v1634_v62 = vld [vmem:[%s3398_s1 + $0x38] sm:$0xff]  ;;  %v3503_v34 = vld [vmem:[#allocation8_spill] sm:$0xff] }
 0x192   :  { %v1029_v31 = vadd.f32 %v2563_v47, %v1028_v32  ;;  %v1083_v57 = vsel %vm1080_vm7, %v1082_v40, %v1078_v30  ;;  %v1036_v24 = vand.u32 2147483648, %v2515_v23  ;;  %v3491_v12 = vsub.f32 1.0, %v2623_v10  ;;  %v3504_v50 = vld [vmem:[#allocation18_spill] sm:$0xff]  ;;  %v3509_v30 = vld [vmem:[#allocation4_spill] sm:$0xff] }
 0x193   :  { %vm1045_vm11 = vweird.f32 %v2553_v25  ;;  %v1260_v15 = vsub.f32 1.0, %v1083_v57  ;;  %v1292_v49 = vmul.f32 %v1634_v62, %v1083_v57  ;;  %v1307_v58 = vadd.f32 %v1291_v54, %v1275_v60  ;;  %v3507_v32 = vld [vmem:[#allocation6_spill] sm:$0xff]  ;;  %v1637_v60 = vld [vmem:[%s3398_s1 + $0x10] sm:$0xff]  ;;  %v3513_v62 = vld [vmem:[#allocation9_spill] sm:$0xff] }
 0x194   :  { %v1043_v11 = vmul.f32 %v2603_v16, %v3491_v12  ;;  %v1033_v48 = vsel %vm3246_vm10, %v2563_v47, %v1029_v31  ;;  %vm1035_vm12 = vcmp.eq.f32.partialorder %v1034_v63, 8.507059e+37  ;;  %v1037_v44 = vor.u32 1.1754944e-38, %v1036_v24  ;;  %1352 = vmatpush.bf16.msra.mxu2 %v1339_v61 }
 0x195   :  { %vm1046_vm13 = vweird.f32 %v2603_v16  ;;  %v1276_v10 = vmul.f32 %v2793_v4, %v1260_v15  ;;  %1323 = vst [vmem:[%s3401_s8 + $0x30] sm:$0xff] %v1307_v58  ;;  %v1049_v20 = vand.u32 2147483647, %v2553_v25  ;;  %v1051_v47 = vand.u32 2147483648, %v2553_v25  ;;  %v1635_v25 = vld [vmem:[%s3398_s1 + $0x20] sm:$0xff] }
 0x196   :  { %v1044_v23 = vadd.f32 %v2603_v16, %v1043_v11  ;;  %vm3267_vm14 = vmor %vm1045_vm11, %vm1046_vm13  ;;  %v3494_v22 = vsub.f32 1.0, %v2513_v35  ;;  %v1038_v2 = vsel %vm1035_vm12, %v1037_v44, %v1033_v48  ;;  %vm1000_vm15 = vweird.f32 %v3496_v42 }
 0x197   :  { %vm1001_vm0 = vweird.f32 %v3495_v21  ;;  %v1308_v33 = vadd.f32 %v1292_v49, %v1276_v10  ;;  %vm1050_vm1 = vcmp.eq.f32.partialorder %v1049_v20, 8.507059e+37  ;;  %v1052_v37 = vor.u32 1.1754944e-38, %v1051_v47 }
 0x198   :  { %v998_v3 = vmul.f32 %v3495_v21, %v3494_v22  ;;  %v1048_v4 = vsel %vm3267_vm14, %v2603_v16, %v1044_v23  ;;  %v1257_v28 = vsub.f32 1.0, %v1038_v2  ;;  %v1289_v35 = vmul.f32 %v1635_v25, %v1038_v2  ;;  %vm3293_vm2 = vmor %vm1000_vm15, %vm1001_vm0  ;;  %v3516_v23 = vld [vmem:[#allocation15_spill] sm:$0xff]  ;;  %v3518_v2 = vld [vmem:[#allocation16_spill] sm:$0xff] }
 0x199   :  { %v1004_v18 = vand.u32 2147483647, %v3496_v42  ;;  %v1006_v26 = vand.u32 2147483648, %v3496_v42  ;;  %1324 = vst [vmem:[%s3401_s8 + $0x38] sm:$0xff] %v1308_v33  ;;  %v1338_v16 = vpack.c.bf16 %v1308_v33, %v1307_v58  ;;  %v1053_v27 = vsel %vm1050_vm1, %v1052_v37, %v1048_v4  ;;  %v3515_v58 = vld [vmem:[#allocation7_spill] sm:$0xff]  ;;  %v1363_v37 = vld [vmem:[%s3402_s7] sm:$0xff] }
 0x19a   :  { %v999_v46 = vadd.f32 %v3495_v21, %v998_v3  ;;  %v1273_v1 = vmul.f32 %v3497_v9, %v1257_v28  ;;  %v3501_v55 = vsub.f32 1.0, %v3500_v43  ;;  %v1258_v5 = vsub.f32 1.0, %v1053_v27  ;;  %v3517_v3 = vld [vmem:[#allocation3_spill] sm:$0xff]  ;;  %v1639_v43 = vld [vmem:[%s3398_s1] sm:$0xff] }
 0x19b   :  { %v1290_v39 = vmul.f32 %v1636_v41, %v1053_v27  ;;  %vm1005_vm3 = vcmp.eq.f32.partialorder %v1004_v18, 8.507059e+37  ;;  %1353 = vmatpush.bf16.msra.mxu2 %v1338_v16  ;;  %v1007_v7 = vor.u32 1.1754944e-38, %v1006_v26  ;;  %vm1015_vm4 = vweird.f32 %v3503_v34  ;;  %v3522_v41 = vld [vmem:[#allocation12_spill] sm:$0xff] }
 0x19c   :  { %v1013_v13 = vmul.f32 %v3502_v51, %v3501_v55  ;;  %v1003_v52 = vsel %vm3293_vm2, %v3495_v21, %v999_v46  ;;  %v1305_v17 = vadd.f32 %v1289_v35, %v1273_v1  ;;  %v1274_v8 = vmul.f32 %v3504_v50, %v1258_v5  ;;  %v3521_v1 = vld [vmem:[#allocation11_spill] sm:$0xff]  ;;  %v1425_v50 = vld [vmem:[%s3403_s6] sm:$0xff] }
 0x19d   :  { %vm1016_vm5 = vweird.f32 %v3502_v51  ;;  %v1019_v14 = vand.u32 2147483647, %v3503_v34  ;;  %v1021_v56 = vand.u32 2147483648, %v3503_v34  ;;  %v1008_v19 = vsel %vm1005_vm3, %v1007_v7, %v1003_v52  ;;  %v1640_v52 = vld [vmem:[%s3398_s1 + $0x8] sm:$0xff] }
 0x19e   :  { %v1014_v0 = vadd.f32 %v3502_v51, %v1013_v13  ;;  %1321 = vst [vmem:[%s3401_s8 + $0x20] sm:$0xff] %v1305_v17  ;;  %vm3315_vm6 = vmor %vm1015_vm4, %vm1016_vm5  ;;  %v3508_v36 = vsub.f32 1.0, %v3507_v32  ;;  %vm970_vm7 = vweird.f32 %v3510_v38  ;;  %vm971_vm8 = vweird.f32 %v3509_v30  ;;  %v1364_v7 = vld [vmem:[%s3402_s7 + $0x8] sm:$0xff] }
 0x19f   :  { %v1306_v54 = vadd.f32 %v1290_v39, %v1274_v8  ;;  %vm1020_vm9 = vcmp.eq.f32.partialorder %v1019_v14, 8.507059e+37  ;;  %v1022_v31 = vor.u32 1.1754944e-38, %v1021_v56  ;;  %v1255_v61 = vsub.f32 1.0, %v1008_v19  ;;  %vm3335_vm10 = vmor %vm970_vm7, %vm971_vm8 }
 0x1a0   :  { %v968_v6 = vmul.f32 %v3509_v30, %v3508_v36  ;;  %v1018_v40 = vsel %vm3315_vm6, %v3502_v51, %v1014_v0  ;;  %v1287_v63 = vmul.f32 %v1637_v60, %v1008_v19  ;;  %v974_v45 = vand.u32 2147483647, %v3510_v38 }
 0x1a1   :  { %1322 = vst [vmem:[%s3401_s8 + $0x28] sm:$0xff] %v1306_v54  ;;  %v1337_v24 = vpack.c.bf16 %v1306_v54, %v1305_v17  ;;  %v1023_v12 = vsel %vm1020_vm9, %v1022_v31, %v1018_v40  ;;  %v976_v15 = vand.u32 2147483648, %v3510_v38  ;;  %v3514_v49 = vsub.f32 1.0, %v3513_v62 }
 0x1a2   :  { %v969_v57 = vadd.f32 %v3509_v30, %v968_v6  ;;  %v1256_v44 = vsub.f32 1.0, %v1023_v12  ;;  %v1271_v10 = vmul.f32 %v3516_v23, %v1255_v61  ;;  %v1288_v20 = vmul.f32 %v1638_v59, %v1023_v12 }
 0x1a3   :  { %v983_v48 = vmul.f32 %v3515_v58, %v3514_v49  ;;  %1354 = vmatpush.bf16.msra.mxu2 %v1337_v24  ;;  %vm975_vm11 = vcmp.eq.f32.partialorder %v974_v45, 8.507059e+37  ;;  %v977_v22 = vor.u32 1.1754944e-38, %v976_v15  ;;  %vm985_vm12 = vweird.f32 %v3517_v3 }
 0x1a4   :  { %v973_v47 = vsel %vm3335_vm10, %v3509_v30, %v969_v57  ;;  %v1272_v4 = vmul.f32 %v3518_v2, %v1256_v44  ;;  %v1303_v42 = vadd.f32 %v1287_v63, %v1271_v10  ;;  %vm986_vm13 = vweird.f32 %v3515_v58 }
 0x1a5   :  { %v984_v21 = vadd.f32 %v3515_v58, %v983_v48  ;;  %v989_v33 = vand.u32 2147483647, %v3517_v3  ;;  %v978_v28 = vsel %vm975_vm11, %v977_v22, %v973_v47  ;;  %vm3358_vm14 = vmor %vm985_vm12, %vm986_vm13  ;;  %v991_v35 = vand.u32 2147483648, %v3517_v3 }
 0x1a6   :  { %v1304_v46 = vadd.f32 %v1288_v20, %v1272_v4  ;;  %1319 = vst [vmem:[%s3401_s8 + $0x10] sm:$0xff] %v1303_v42  ;;  %v1253_v26 = vsub.f32 1.0, %v978_v28  ;;  %v1641_v16 = vmov 0   ;;  %v1285_v55 = vmul.f32 %v1639_v43, %v978_v28 }
 0x1a7   :  { %v988_v18 = vsel %vm3358_vm14, %v3515_v58, %v984_v21  ;;  %1464 = vset.pattern.permute.xlu0 %v1641_v16  ;;  %v992_v27 = vor.u32 1.1754944e-38, %v991_v35  ;;  %vm990_vm15 = vcmp.eq.f32.partialorder %v989_v33, 8.507059e+37 }
 0x1a8   :  { %1367 = vperm.xlu0 %1464, %v1363_v37   ;;  %1320 = vst [vmem:[%s3401_s8 + $0x18] sm:$0xff] %v1304_v46  ;;  %v1336_v9 = vpack.c.bf16 %v1304_v46, %v1303_v42  ;;  %v1269_v53 = vmul.f32 %v3521_v1, %v1253_v26 }
 0x1a9   :  { %v993_v51 = vsel %vm990_vm15, %v992_v27, %v988_v18 }
 0x1aa   :  { %1355 = vmatpush.bf16.msra.mxu2 %v1336_v9  ;;  %v1254_v13 = vsub.f32 1.0, %v993_v51  ;;  %v1301_v5 = vadd.f32 %v1285_v55, %v1269_v53  ;;  %v1286_v17 = vmul.f32 %v1640_v52, %v993_v51 }
 0x1ac   :  { %v1270_v39 = vmul.f32 %v3522_v41, %v1254_v13  ;;  %1317 = vst [vmem:[%s3401_s8] sm:$0xff] %v1301_v5 }
 0x1ae   :  { %v1302_v0 = vadd.f32 %v1286_v17, %v1270_v39 }
 0x1b0   :  { %1372 = vperm.xlu0 %1464, %v1364_v7   ;;  %1318 = vst [vmem:[%s3401_s8 + $0x8] sm:$0xff] %v1302_v0  ;;  %v1335_v34 = vpack.c.bf16 %v1302_v0, %v1301_v5 }
 0x1b2   :  { %1356 = vmatpush.bf16.msra.mxu2 %v1335_v34 }
 0x1b5   :  { %1357 = vmatmul.bf16.vlgmr.msra.gmra.mxu2 %v1425_v50 }
 0x21a   :  { %v1368_v8 = vpop.permute.xlu0 %1367 }
 0x222   :  { %v1373_v56 = vpop.permute.xlu0 %1372 }
 0x238   :  { %v1358_v14 = vpop.f32.mrf.mxu2 }
 0x239   :  { %v1375_v29 = vmul.f32 %v1368_v8, %v1358_v14 }
 0x240   :  { %v1360_v19 = vpop.f32.mrf.mxu2 }
 0x241   :  { %v1376_v32 = vmul.f32 %v1373_v56, %v1360_v19 }
 0x243   :  { %v1429_v36 = vpack.c.bf16 %v1376_v32, %v1375_v29 }
 0x245   :  { %1430 = vst [vmem:[%s3404_s9] sm:$0xff] %v1429_v36  }

</bundles_post_ra>
